<compile_context>
chip_gen: v5e
topology: v5e:2x2
jax: 0.10.0
libtpu: 0.0.40
codegen_flags: <defaults>
</compile_context>

<pallas_src>
import functools
import math

import jax
import jax.numpy as jnp
from jax import lax
from jax.experimental import pallas as pl
from jax.experimental.pallas import tpu as pltpu


def _round_up(x, m):
    return ((x + m - 1) // m) * m


def _pad2d(a, rows, cols):
    pr, pc = rows - a.shape[0], cols - a.shape[1]
    if pr or pc:
        a = jnp.pad(a, ((0, pr), (0, pc)))
    return a


def _mlp_ln_kernel(x_ref, w1_ref, b1_ref, w2_ref, b2_ref, g_ref, beta_ref,
                   o_ref, acc_ref, *, d_real):
    """Grid = (row_tiles, h_tiles). h (reduction over 4*D) is the last axis."""
    h_idx = pl.program_id(1)

    @pl.when(h_idx == 0)
    def _():
        acc_ref[...] = jnp.zeros_like(acc_ref)

    x = x_ref[...]

    # dense: (tm, Dp) @ (Dp, th) -> relu, f32 accumulation on the MXU.
    inter = jnp.dot(x.astype(w1_ref.dtype), w1_ref[...],
                    preferred_element_type=jnp.float32)
    inter = jnp.maximum(inter + b1_ref[...].astype(jnp.float32), 0.0)

    # dense_output partial contribution: (tm, th) @ (th, Dp) accumulated in f32.
    acc_ref[...] += jnp.dot(inter.astype(w2_ref.dtype), w2_ref[...],
                            preferred_element_type=jnp.float32)

    @pl.when(h_idx == pl.num_programs(1) - 1)
    def _():
        # bias + residual (padded lanes of acc / b2 / x are all exactly zero).
        y = acc_ref[...] + b2_ref[...].astype(jnp.float32) + x.astype(jnp.float32)

        d_pad = y.shape[-1]
        inv_d = 1.0 / float(d_real)
        if d_real != d_pad:
            # Masked LayerNorm over the real D lanes only.
            lane = lax.broadcasted_iota(jnp.int32, y.shape, dimension=1)
            mask = (lane < d_real).astype(jnp.float32)
            mean = jnp.sum(y, axis=-1, keepdims=True) * inv_d   # padded lanes are 0
            centered = (y - mean) * mask
        else:
            mean = jnp.sum(y, axis=-1, keepdims=True) * inv_d
            centered = y - mean
        var = jnp.sum(centered * centered, axis=-1, keepdims=True) * inv_d
        ynorm = centered * lax.rsqrt(var + 1e-12)
        out = ynorm * g_ref[...].astype(jnp.float32) + beta_ref[...].astype(jnp.float32)
        o_ref[...] = out.astype(o_ref.dtype)


def multimodal_mapping(hidden_states, params, *, tm=256, th=512, compute_dtype=None):
    """hidden_states: [B, S, D]. params: dict of weights (f32).

    tm: row (token) tile, default 256 (full MXU rows on v6e/v7x, 2x128 on v5e).
    th: tile of the 4*D hidden axis (bounds resident weight VMEM per grid step).
    compute_dtype: e.g. jnp.bfloat16 to feed the MXU bf16 x/W1/W2 (v6e/v7x recipe);
                   None keeps the input dtypes. Accumulation / LayerNorm stay f32.
    """
    B, S, D = hidden_states.shape
    H = 4 * D
    M = B * S

    tm = _round_up(max(tm, 8), 8)
    d_pad = _round_up(D, 128)
    th = _round_up(min(th, _round_up(H, 128)), 128)
    h_pad = _round_up(H, th)
    m_pad = _round_up(M, tm)

    # Zero-pad everything to lane-dense shapes; padded weights/biases are zero so
    # padded lanes of the pre-LN activation are exactly zero (see masked LN above).
    x2d = _pad2d(hidden_states.reshape(M, D), m_pad, d_pad)
    w1 = _pad2d(params["w1"], d_pad, h_pad)
    b1 = _pad2d(params["b1"].reshape(1, H), 1, h_pad)
    w2 = _pad2d(params["w2"], h_pad, d_pad)
    b2 = _pad2d(params["b2"].reshape(1, D), 1, d_pad)
    gamma = _pad2d(params["gamma"].reshape(1, D), 1, d_pad)
    beta = _pad2d(params["beta"].reshape(1, D), 1, d_pad)

    if compute_dtype is not None:
        x2d = x2d.astype(compute_dtype)
        w1 = w1.astype(compute_dtype)
        w2 = w2.astype(compute_dtype)

    out_dtype = hidden_states.dtype
    in_b = jnp.dtype(x2d.dtype).itemsize
    w_b = jnp.dtype(w1.dtype).itemsize
    out_b = jnp.dtype(out_dtype).itemsize

    # Rough VMEM budget: double-buffered tiles + accumulator + intermediate headroom.
    est = (2 * tm * d_pad * in_b                 # x tiles
           + 2 * 2 * d_pad * th * w_b            # w1 + w2 tiles
           + 2 * (th + 3 * d_pad) * 4            # biases / gamma / beta
           + 2 * tm * d_pad * out_b              # output tiles
           + tm * d_pad * 4                      # f32 accumulator scratch
           + 2 * tm * th * 4)                    # intermediate activation headroom
    vmem_limit = min(56 * 1024 * 1024, max(32 * 1024 * 1024, 2 * est))

    kernel = functools.partial(_mlp_ln_kernel, d_real=D)

    out2d = pl.pallas_call(
        kernel,
        out_shape=jax.ShapeDtypeStruct((m_pad, d_pad), out_dtype),
        grid_spec=pltpu.PrefetchScalarGridSpec(
            num_scalar_prefetch=0,
            grid=(m_pad // tm, h_pad // th),
            in_specs=[
                pl.BlockSpec((tm, d_pad), lambda i, h: (i, 0)),   # x tile (resident over h)
                pl.BlockSpec((d_pad, th), lambda i, h: (0, h)),   # W1 column tile
                pl.BlockSpec((1, th),     lambda i, h: (0, h)),   # b1 tile
                pl.BlockSpec((th, d_pad), lambda i, h: (h, 0)),   # W2 row tile
                pl.BlockSpec((1, d_pad),  lambda i, h: (0, 0)),   # b2
                pl.BlockSpec((1, d_pad),  lambda i, h: (0, 0)),   # gamma
                pl.BlockSpec((1, d_pad),  lambda i, h: (0, 0)),   # beta
            ],
            out_specs=pl.BlockSpec((tm, d_pad), lambda i, h: (i, 0)),
            scratch_shapes=[pltpu.VMEM((tm, d_pad), jnp.float32)],
        ),
        compiler_params=pltpu.CompilerParams(
            dimension_semantics=("parallel", "arbitrary"),
            vmem_limit_bytes=int(vmem_limit)),
    )(x2d, w1, b1, w2, b2, gamma, beta)

    return out2d[:M, :D].reshape(B, S, D)


def init_params(key, dim):
    """Deterministic init mimicking nn.Linear defaults (uniform +-1/sqrt(fan_in))
    and LayerNorm (gamma=1, beta=0)."""
    k1, k2, k3, k4 = jax.random.split(key, 4)
    H = 4 * dim
    lim1 = 1.0 / math.sqrt(dim)
    lim2 = 1.0 / math.sqrt(H)
    return {
        "w1": jax.random.uniform(k1, (dim, H), jnp.float32, -lim1, lim1),
        "b1": jax.random.uniform(k2, (H,), jnp.float32, -lim1, lim1),
        "w2": jax.random.uniform(k3, (H, dim), jnp.float32, -lim2, lim2),
        "b2": jax.random.uniform(k4, (dim,), jnp.float32, -lim2, lim2),
        "gamma": jnp.ones((dim,), jnp.float32),
        "beta": jnp.zeros((dim,), jnp.float32),
    }


def _reference(hidden_states, params):
    """Pure-JAX reference (eval-mode dropout = identity)."""
    x = hidden_states
    h = jnp.maximum(x @ params["w1"] + params["b1"], 0.0)
    y = h @ params["w2"] + params["b2"]
    y = y + x
    mean = jnp.mean(y, axis=-1, keepdims=True)
    var = jnp.mean((y - mean) ** 2, axis=-1, keepdims=True)
    y = (y - mean) / jnp.sqrt(var + 1e-12)
    return y * params["gamma"] + params["beta"]


if __name__ == "__main__":
    key = jax.random.PRNGKey(0)
    kx, kp = jax.random.split(key)

    B, S, D = 2, 8, 32          # batch=2, seq=8, hidden=32
    x = jax.random.normal(kx, (B, S, D), jnp.float32)
    params = init_params(kp, D)

    ref = _reference(x, params)

    # f32 path (default) — exact parity with the reference.
    out = multimodal_mapping(x, params)
    out = jax.block_until_ready(out)
    assert out.shape == (B, S, D)
    assert jnp.allclose(out, ref, atol=1e-4, rtol=1e-4), "f32 kernel mismatch vs reference"

    # bf16 compute path (v6e/v7x MXU recipe) — loose tolerance.
    out_bf16 = multimodal_mapping(x, params, compute_dtype=jnp.bfloat16)
    out_bf16 = jax.block_until_ready(out_bf16)
    assert out_bf16.shape == (B, S, D)
    assert jnp.allclose(out_bf16, ref, atol=1e-1, rtol=1e-1), "bf16 kernel mismatch vs reference"

    print("KERNEL_OK")
</pallas_src>

<mosaic_0001>
module attributes {stable_mosaic.version = 11 : i64} {
  func.func @_mlp_ln_kernel(%arg0: i32, %arg1: i32, %arg2: memref<256x128xf32, #tpu.memory_space<vmem>>, %arg3: memref<128x128xf32, #tpu.memory_space<vmem>>, %arg4: memref<1x128xf32, #tpu.memory_space<vmem>>, %arg5: memref<128x128xf32, #tpu.memory_space<vmem>>, %arg6: memref<1x128xf32, #tpu.memory_space<vmem>>, %arg7: memref<1x128xf32, #tpu.memory_space<vmem>>, %arg8: memref<1x128xf32, #tpu.memory_space<vmem>>, %arg9: memref<256x128xf32, #tpu.memory_space<vmem>>, %arg10: memref<256x128xf32, #tpu.memory_space<vmem>>) attributes {dimension_semantics = [#tpu.dimension_semantics<parallel>, #tpu.dimension_semantics<arbitrary>], iteration_bounds = array<i64: 1, 1>, scalar_prefetch = 0 : i64, scratch_operands = 1 : i64, tpu.core_type = #tpu.core_type<tc>, window_params = [{transform_indices = @transform_0, window_bounds = array<i64: 256, 128>}, {transform_indices = @transform_1, window_bounds = array<i64: 128, 128>}, {transform_indices = @transform_2, window_bounds = array<i64: 1, 128>}, {transform_indices = @transform_3, window_bounds = array<i64: 128, 128>}, {pipeline_mode = #tpu.pipeline_mode<synchronous>, transform_indices = @transform_4, window_bounds = array<i64: 1, 128>}, {pipeline_mode = #tpu.pipeline_mode<synchronous>, transform_indices = @transform_5, window_bounds = array<i64: 1, 128>}, {pipeline_mode = #tpu.pipeline_mode<synchronous>, transform_indices = @transform_6, window_bounds = array<i64: 1, 128>}, {transform_indices = @transform_7, window_bounds = array<i64: 256, 128>}]} {
    %c0_i32 = arith.constant 0 : i32
    %0 = arith.cmpi eq, %arg1, %c0_i32 : i32
    %1 = arith.extui %0 : i1 to i32
    %c0_i32_0 = arith.constant 0 : i32
    %2 = arith.cmpi ne, %1, %c0_i32_0 : i32
    scf.if %2 {
      %cst_16 = arith.constant 0.000000e+00 : f32
      %19 = vector.broadcast %cst_16 : f32 to vector<256x128xf32>
      %c0_17 = arith.constant 0 : index
      %c0_18 = arith.constant 0 : index
      %20 = vector.load %arg10[%c0_17, %c0_18] : memref<256x128xf32, #tpu.memory_space<vmem>>, vector<256x128xf32>
      tpu.vector_store %arg10[%c0_17, %c0_18], %19 {strides = array<i32>} : memref<256x128xf32, #tpu.memory_space<vmem>>, vector<256x128xf32>,
    } else {
    }
    %c0 = arith.constant 0 : index
    %c0_1 = arith.constant 0 : index
    %3 = vector.load %arg2[%c0, %c0_1] : memref<256x128xf32, #tpu.memory_space<vmem>>, vector<256x128xf32>
    %c0_2 = arith.constant 0 : index
    %c0_3 = arith.constant 0 : index
    %4 = vector.load %arg3[%c0_2, %c0_3] : memref<128x128xf32, #tpu.memory_space<vmem>>, vector<128x128xf32>
    %cst = arith.constant dense<0.000000e+00> : vector<256x128xf32>
    %5 = tpu.matmul %3, %4, %cst {dimension_numbers = #tpu.dot_dimension_numbers<[1], [0], [0], [1], [0, 0, 1, 1], [], []>} : vector<256x128xf32>, vector<128x128xf32>, vector<256x128xf32> -> vector<256x128xf32>
    %c0_4 = arith.constant 0 : index
    %c0_5 = arith.constant 0 : index
    %6 = vector.load %arg4[%c0_4, %c0_5] : memref<1x128xf32, #tpu.memory_space<vmem>>, vector<1x128xf32>
    %7 = vector.broadcast %6 : vector<1x128xf32> to vector<256x128xf32>
    %8 = arith.addf %5, %7 : vector<256x128xf32>
    %cst_6 = arith.constant 0.000000e+00 : f32
    %9 = vector.broadcast %cst_6 : f32 to vector<256x128xf32>
    %10 = arith.maximumf %8, %9 : vector<256x128xf32>
    %c0_7 = arith.constant 0 : index
    %c0_8 = arith.constant 0 : index
    %11 = vector.load %arg10[%c0_7, %c0_8] : memref<256x128xf32, #tpu.memory_space<vmem>>, vector<256x128xf32>
    %c0_9 = arith.constant 0 : index
    %c0_10 = arith.constant 0 : index
    %12 = vector.load %arg5[%c0_9, %c0_10] : memref<128x128xf32, #tpu.memory_space<vmem>>, vector<128x128xf32>
    %cst_11 = arith.constant dense<0.000000e+00> : vector<256x128xf32>
    %13 = tpu.matmul %10, %12, %cst_11 {dimension_numbers = #tpu.dot_dimension_numbers<[1], [0], [0], [1], [0, 0, 1, 1], [], []>} : vector<256x128xf32>, vector<128x128xf32>, vector<256x128xf32> -> vector<256x128xf32>
    %14 = arith.addf %11, %13 : vector<256x128xf32>
    %c0_12 = arith.constant 0 : index
    %c0_13 = arith.constant 0 : index
    %15 = vector.load %arg10[%c0_12, %c0_13] : memref<256x128xf32, #tpu.memory_space<vmem>>, vector<256x128xf32>
    tpu.vector_store %arg10[%c0_12, %c0_13], %14 {strides = array<i32>} : memref<256x128xf32, #tpu.memory_space<vmem>>, vector<256x128xf32>,
    %c0_i32_14 = arith.constant 0 : i32
    %16 = arith.cmpi eq, %arg1, %c0_i32_14 : i32
    %17 = arith.extui %16 : i1 to i32
    %c0_i32_15 = arith.constant 0 : i32
    %18 = arith.cmpi ne, %17, %c0_i32_15 : i32
    scf.if %18 {
      %c0_16 = arith.constant 0 : index
      %c0_17 = arith.constant 0 : index
      %19 = vector.load %arg10[%c0_16, %c0_17] : memref<256x128xf32, #tpu.memory_space<vmem>>, vector<256x128xf32>
      %c0_18 = arith.constant 0 : index
      %c0_19 = arith.constant 0 : index
      %20 = vector.load %arg6[%c0_18, %c0_19] : memref<1x128xf32, #tpu.memory_space<vmem>>, vector<1x128xf32>
      %21 = vector.broadcast %20 : vector<1x128xf32> to vector<256x128xf32>
      %22 = arith.addf %19, %21 : vector<256x128xf32>
      %23 = arith.addf %22, %3 : vector<256x128xf32>
      %24 = tpu.iota {dimensions = array<i32: 1>} : vector<256x128xi32>
      %c32_i32 = arith.constant 32 : i32
      %25 = vector.broadcast %c32_i32 : i32 to vector<256x128xi32>
      %26 = arith.cmpi slt, %24, %25 : vector<256x128xi32>
      %27 = arith.extui %26 : vector<256x128xi1> to vector<256x128xi32>
      %28 = arith.sitofp %27 : vector<256x128xi32> to vector<256x128xf32>
      %cst_20 = arith.constant dense<0.000000e+00> : vector<256xf32>
      %29 = vector.multi_reduction <add>, %23, %cst_20 [1] : vector<256x128xf32> to vector<256xf32>
      %30 = vector.shape_cast %29 : vector<256xf32> to vector<256x1xf32>
      %cst_21 = arith.constant 3.125000e-02 : f32
      %31 = vector.broadcast %cst_21 : f32 to vector<256x1xf32>
      %32 = arith.mulf %30, %31 : vector<256x1xf32>
      %33 = vector.broadcast %32 : vector<256x1xf32> to vector<256x128xf32>
      %34 = arith.subf %23, %33 : vector<256x128xf32>
      %35 = arith.mulf %34, %28 : vector<256x128xf32>
      %36 = arith.mulf %35, %35 : vector<256x128xf32>
      %cst_22 = arith.constant dense<0.000000e+00> : vector<256xf32>
      %37 = vector.multi_reduction <add>, %36, %cst_22 [1] : vector<256x128xf32> to vector<256xf32>
      %38 = vector.shape_cast %37 : vector<256xf32> to vector<256x1xf32>
      %cst_23 = arith.constant 3.125000e-02 : f32
      %39 = vector.broadcast %cst_23 : f32 to vector<256x1xf32>
      %40 = arith.mulf %38, %39 : vector<256x1xf32>
      %cst_24 = arith.constant 9.99999996E-13 : f32
      %41 = vector.broadcast %cst_24 : f32 to vector<256x1xf32>
      %42 = arith.addf %40, %41 : vector<256x1xf32>
      %43 = math.rsqrt %42 : vector<256x1xf32>
      %44 = vector.broadcast %43 : vector<256x1xf32> to vector<256x128xf32>
      %45 = arith.mulf %35, %44 : vector<256x128xf32>
      %c0_25 = arith.constant 0 : index
      %c0_26 = arith.constant 0 : index
      %46 = vector.load %arg7[%c0_25, %c0_26] : memref<1x128xf32, #tpu.memory_space<vmem>>, vector<1x128xf32>
      %47 = vector.broadcast %46 : vector<1x128xf32> to vector<256x128xf32>
      %48 = arith.mulf %45, %47 : vector<256x128xf32>
      %c0_27 = arith.constant 0 : index
      %c0_28 = arith.constant 0 : index
      %49 = vector.load %arg8[%c0_27, %c0_28] : memref<1x128xf32, #tpu.memory_space<vmem>>, vector<1x128xf32>
      %50 = vector.broadcast %49 : vector<1x128xf32> to vector<256x128xf32>
      %51 = arith.addf %48, %50 : vector<256x128xf32>
      %c0_29 = arith.constant 0 : index
      %c0_30 = arith.constant 0 : index
      %52 = vector.load %arg9[%c0_29, %c0_30] : memref<256x128xf32, #tpu.memory_space<vmem>>, vector<256x128xf32>
      tpu.vector_store %arg9[%c0_29, %c0_30], %51 {strides = array<i32>} : memref<256x128xf32, #tpu.memory_space<vmem>>, vector<256x128xf32>,
    } else {
    }
    return
  }
  func.func @transform_0(%arg0: i32, %arg1: i32) -> (i32, i32) {
    %c0_i32 = arith.constant 0 : i32
    %c0_i32_0 = arith.constant 0 : i32
    return %arg0, %c0_i32 : i32, i32
  }
  func.func @transform_1(%arg0: i32, %arg1: i32) -> (i32, i32) {
    %c0_i32 = arith.constant 0 : i32
    %c0_i32_0 = arith.constant 0 : i32
    return %c0_i32, %arg1 : i32, i32
  }
  func.func @transform_2(%arg0: i32, %arg1: i32) -> (i32, i32) {
    %c0_i32 = arith.constant 0 : i32
    %c0_i32_0 = arith.constant 0 : i32
    return %c0_i32, %arg1 : i32, i32
  }
  func.func @transform_3(%arg0: i32, %arg1: i32) -> (i32, i32) {
    %c0_i32 = arith.constant 0 : i32
    %c0_i32_0 = arith.constant 0 : i32
    return %arg1, %c0_i32 : i32, i32
  }
  func.func @transform_4(%arg0: i32, %arg1: i32) -> (i32, i32) {
    %c0_i32 = arith.constant 0 : i32
    %c0_i32_0 = arith.constant 0 : i32
    %c0_i32_1 = arith.constant 0 : i32
    return %c0_i32, %c0_i32_0 : i32, i32
  }
  func.func @transform_5(%arg0: i32, %arg1: i32) -> (i32, i32) {
    %c0_i32 = arith.constant 0 : i32
    %c0_i32_0 = arith.constant 0 : i32
    %c0_i32_1 = arith.constant 0 : i32
    return %c0_i32, %c0_i32_0 : i32, i32
  }
  func.func @transform_6(%arg0: i32, %arg1: i32) -> (i32, i32) {
    %c0_i32 = arith.constant 0 : i32
    %c0_i32_0 = arith.constant 0 : i32
    %c0_i32_1 = arith.constant 0 : i32
    return %c0_i32, %c0_i32_0 : i32, i32
  }
  func.func @transform_7(%arg0: i32, %arg1: i32) -> (i32, i32) {
    %c0_i32 = arith.constant 0 : i32
    %c0_i32_0 = arith.constant 0 : i32
    return %arg0, %c0_i32 : i32, i32
  }
}

</mosaic_0001>

<bundles_post_ra>
// kernel: tpu_custom_call.1
= control target key start
LH: loop header
LB: loop body
LE: loop exit
PB: predicated region body
PF: predicated region fallthrough
CT: control target
= control target key end

     0   :  { %12 = vsyncpa [#allocation4], 0  ;;  %s2492_s0 = inlined_call_operand.hbm [shape: f32[256,128], index: 0, kind: input, shape index: {}]   ;;  %s2493_s1 = inlined_call_operand.hbm [shape: f32[128,128], index: 1, kind: input, shape index: {}]   ;;  %s2494_s2 = inlined_call_operand.vmem [shape: f32[1,128], index: 2, kind: input, shape index: {}]   ;;  %s2495_s3 = inlined_call_operand.hbm [shape: f32[128,128], index: 3, kind: input, shape index: {}]   ;;  %s2496_s4 = inlined_call_operand.vmem [shape: f32[1,128], index: 4, kind: input, shape index: {}]   ;;  %s2497_s5 = inlined_call_operand.vmem [shape: f32[1,128], index: 5, kind: input, shape index: {}]   ;;  %s2498_s6 = inlined_call_operand.vmem [shape: f32[1,128], index: 6, kind: input, shape index: {}]   ;;  %s2499_s7 = inlined_call_operand.hbm [shape: f32[256,128], index: 7, kind: output, shape index: {}]  }
   0x1   :  { %13 = vsyncpa [#allocation7], 0 }
   0x2   :  { %14 = vsyncpa [#allocation5], 0  ;;  %s32_s26 = sshll.u32 %s2493_s1, 4  ;;  %s1648_s27 = smov [#allocation6]   ;;  %s33_s26 = int_to_ptr.hbm [resolvable:$true] %s32_s26 }
   0x3   :  { %s34_s28 = sshll.u32 %s1648_s27, 4  ;;  %s19_s8 = sshll.u32 %s2492_s0, 4  ;;  %s35_s28 = int_to_ptr.vmem [resolvable:$true] %s34_s28  ;;  %s20_s8 = int_to_ptr.hbm [resolvable:$true] %s19_s8 }
   0x4   :  { %s1649_s9 = smov 128   ;;  %s1650_s10 = smov 8  }
   0x5   :  { %40 = dma.hbm_to_vmem [thread:$0]  %s33_s26, 2048, %s35_s28, [#allocation7], %s1649_s9, %s1649_s9, %s1650_s10  }
   0x6   :  { %s1651_s11 = smov [#allocation3]   ;;  %s47_s1 = sshll.u32 %s2495_s3, 4  ;;  %s48_s1 = int_to_ptr.hbm [resolvable:$true] %s47_s1 }
   0x7   :  { %s21_s12 = sshll.u32 %s1651_s11, 4  ;;  %s1652_s0 = smov [#allocation8]   ;;  %s22_s12 = int_to_ptr.vmem [resolvable:$true] %s21_s12 }
   0x8   :  { %27 = dma.hbm_to_vmem [thread:$0]  %s20_s8, 4096, %s22_s12, [#allocation4], %s1649_s9, %s1649_s9, %s1650_s10  }
   0x9   :  { %s49_s15 = sshll.u32 %s1652_s0, 4  ;;  %s50_s15 = int_to_ptr.vmem [resolvable:$true] %s49_s15 }
   0xa   :  { %55 = dma.hbm_to_vmem [thread:$0]  %s48_s1, 2048, %s50_s15, [#allocation7], %s1649_s9, %s1649_s9, %s1650_s10  }
   0xb   :  { %1642 = dma.done.wait [#allocation4], 4096  }
   0xc   :  { %1643 = vsyncadd [#allocation4], 4294963200 }
   0xd   :  { %1644 = dma.done.wait [#allocation7], 4096  }
   0xe   :  { %1645 = vsyncadd [#allocation7], 4294963200  ;;  %v157_v0 = vld [vmem:[#allocation6 + $0x78] sm:$0xff]  ;;  %v156_v1 = vld [vmem:[#allocation6 + $0x70] sm:$0xff]  ;;  %s1422_s27 = sshll.u32 %s2499_s7, 4  ;;  %s1423_s27 = int_to_ptr.hbm [resolvable:$true] %s1422_s27 }
   0xf   :  { %162 = vmatpush.msra.mxu0 %v157_v0  ;;  %1437 = vmatpush.msra.mxu2 %v157_v0  ;;  %v155_v2 = vld [vmem:[#allocation6 + $0x68] sm:$0xff]  ;;  %v154_v3 = vld [vmem:[#allocation6 + $0x60] sm:$0xff]  ;;  %v153_v4 = vld [vmem:[#allocation6 + $0x58] sm:$0xff] }
  0x10   :  { %v152_v5 = vld [vmem:[#allocation6 + $0x50] sm:$0xff]  ;;  %v151_v6 = vld [vmem:[#allocation6 + $0x48] sm:$0xff]  ;;  %v150_v7 = vld [vmem:[#allocation6 + $0x40] sm:$0xff] }
  0x11   :  { %163 = vmatpush.msra.mxu0 %v156_v1  ;;  %1438 = vmatpush.msra.mxu2 %v156_v1  ;;  %v149_v8 = vld [vmem:[#allocation6 + $0x38] sm:$0xff]  ;;  %v148_v9 = vld [vmem:[#allocation6 + $0x30] sm:$0xff]  ;;  %v147_v10 = vld [vmem:[#allocation6 + $0x28] sm:$0xff] }
  0x12   :  { %v146_v11 = vld [vmem:[#allocation6 + $0x20] sm:$0xff]  ;;  %v145_v12 = vld [vmem:[#allocation6 + $0x18] sm:$0xff]  ;;  %v144_v13 = vld [vmem:[#allocation6 + $0x10] sm:$0xff] }
  0x13   :  { %164 = vmatpush.msra.mxu0 %v155_v2  ;;  %1439 = vmatpush.msra.mxu2 %v155_v2  ;;  %v143_v14 = vld [vmem:[#allocation6 + $0x8] sm:$0xff]  ;;  %v142_v15 = vld [vmem:[#allocation6] sm:$0xff]  ;;  %v1725_v20 = vld [vmem:[#allocation3 + $0x10] sm:$0xff] }
  0x14   :  { %v1713_v16 = vld [vmem:[#allocation3] sm:$0xff]  ;;  %v1719_v18 = vld [vmem:[#allocation3 + $0x8] sm:$0xff]  ;;  %v1727_v21 = vld [vmem:[#allocation3 + $0x90] sm:$0xff] }
  0x15   :  { %165 = vmatpush.msra.mxu0 %v154_v3  ;;  %1440 = vmatpush.msra.mxu2 %v154_v3  ;;  %v1715_v17 = vld [vmem:[#allocation3 + $0x80] sm:$0xff]  ;;  %v1721_v19 = vld [vmem:[#allocation3 + $0x88] sm:$0xff]  ;;  %v1731_v22 = vld [vmem:[#allocation3 + $0x18] sm:$0xff] }
  0x16   :  { %v1733_v23 = vld [vmem:[#allocation3 + $0x98] sm:$0xff]  ;;  %v1737_v24 = vld [vmem:[#allocation3 + $0x20] sm:$0xff]  ;;  %v1743_v26 = vld [vmem:[#allocation3 + $0x28] sm:$0xff] }
  0x17   :  { %166 = vmatpush.msra.mxu0 %v153_v4  ;;  %1441 = vmatpush.msra.mxu2 %v153_v4  ;;  %v1739_v25 = vld [vmem:[#allocation3 + $0xa0] sm:$0xff]  ;;  %v1745_v27 = vld [vmem:[#allocation3 + $0xa8] sm:$0xff]  ;;  %v1749_v28 = vld [vmem:[#allocation3 + $0x30] sm:$0xff] }
  0x18   :  { %v1751_v29 = vld [vmem:[#allocation3 + $0xb0] sm:$0xff]  ;;  %v1755_v30 = vld [vmem:[#allocation3 + $0x38] sm:$0xff]  ;;  %v1761_v32 = vld [vmem:[#allocation3 + $0x40] sm:$0xff] }
  0x19   :  { %167 = vmatpush.msra.mxu0 %v152_v5  ;;  %1442 = vmatpush.msra.mxu2 %v152_v5  ;;  %v1757_v31 = vld [vmem:[#allocation3 + $0xb8] sm:$0xff]  ;;  %v1763_v33 = vld [vmem:[#allocation3 + $0xc0] sm:$0xff]  ;;  %v353_v35 = vld [vmem:[#allocation8 + $0x70] sm:$0xff] }
  0x1a   :  { %v354_v34 = vld [vmem:[#allocation8 + $0x78] sm:$0xff]  ;;  %v352_v36 = vld [vmem:[#allocation8 + $0x68] sm:$0xff]  ;;  %v351_v39 = vld [vmem:[#allocation8 + $0x60] sm:$0xff] }
  0x1b   :  { %168 = vmatpush.msra.mxu0 %v151_v6  ;;  %1443 = vmatpush.msra.mxu2 %v151_v6  ;;  %v1767_v37 = vld [vmem:[#allocation3 + $0x48] sm:$0xff]  ;;  %v350_v40 = vld [vmem:[#allocation8 + $0x58] sm:$0xff]  ;;  %v349_v41 = vld [vmem:[#allocation8 + $0x50] sm:$0xff] }
  0x1c   :  { %355 = vmatpush.msra.mxu1 %v354_v34  ;;  %1453 = vmatpush.msra.mxu3 %v354_v34  ;;  %v1769_v38 = vld [vmem:[#allocation3 + $0xc8] sm:$0xff]  ;;  %v1773_v43 = vld [vmem:[#allocation3 + $0x50] sm:$0xff]  ;;  %v347_v45 = vld [vmem:[#allocation8 + $0x40] sm:$0xff] }
  0x1d   :  { %169 = vmatpush.msra.mxu0 %v150_v7  ;;  %1444 = vmatpush.msra.mxu2 %v150_v7  ;;  %v348_v42 = vld [vmem:[#allocation8 + $0x48] sm:$0xff]  ;;  %v1775_v44 = vld [vmem:[#allocation3 + $0xd0] sm:$0xff]  ;;  %v346_v46 = vld [vmem:[#allocation8 + $0x38] sm:$0xff] }
  0x1e   :  { %356 = vmatpush.msra.mxu1 %v353_v35  ;;  %1454 = vmatpush.msra.mxu3 %v353_v35  ;;  %v345_v47 = vld [vmem:[#allocation8 + $0x30] sm:$0xff]  ;;  %v344_v48 = vld [vmem:[#allocation8 + $0x28] sm:$0xff]  ;;  %v1779_v49 = vld [vmem:[#allocation3 + $0x58] sm:$0xff] }
  0x1f   :  { %170 = vmatpush.msra.mxu0 %v149_v8  ;;  %1445 = vmatpush.msra.mxu2 %v149_v8  ;;  %v1781_v50 = vld [vmem:[#allocation3 + $0xd8] sm:$0xff]  ;;  %v343_v51 = vld [vmem:[#allocation8 + $0x20] sm:$0xff]  ;;  %v341_v53 = vld [vmem:[#allocation8 + $0x10] sm:$0xff] }
  0x20   :  { %357 = vmatpush.msra.mxu1 %v352_v36  ;;  %1455 = vmatpush.msra.mxu3 %v352_v36  ;;  %v342_v52 = vld [vmem:[#allocation8 + $0x18] sm:$0xff]  ;;  %v1785_v54 = vld [vmem:[#allocation3 + $0x60] sm:$0xff]  ;;  %v340_v56 = vld [vmem:[#allocation8 + $0x8] sm:$0xff] }
  0x21   :  { %171 = vmatpush.msra.mxu0 %v148_v9  ;;  %1446 = vmatpush.msra.mxu2 %v148_v9  ;;  %v1787_v55 = vld [vmem:[#allocation3 + $0xe0] sm:$0xff]  ;;  %v1791_v58 = vld [vmem:[#allocation3 + $0x68] sm:$0xff]  ;;  %v1797_v60 = vld [vmem:[#allocation3 + $0x70] sm:$0xff] }
  0x22   :  { %358 = vmatpush.msra.mxu1 %v351_v39  ;;  %1456 = vmatpush.msra.mxu3 %v351_v39  ;;  %v339_v57 = vld [vmem:[#allocation8] sm:$0xff]  ;;  %v1793_v59 = vld [vmem:[#allocation3 + $0xe8] sm:$0xff]  ;;  %v1799_v61 = vld [vmem:[#allocation3 + $0xf0] sm:$0xff] }
  0x23   :  { %172 = vmatpush.msra.mxu0 %v147_v10  ;;  %1447 = vmatpush.msra.mxu2 %v147_v10  ;;  %v1803_v62 = vld [vmem:[#allocation3 + $0x78] sm:$0xff]  ;;  %v1812_v0 = vld [vmem:[%s2494_s2] ss:$0 sm:$0xff] }
  0x24   :  { %359 = vmatpush.msra.mxu1 %v350_v40  ;;  %1457 = vmatpush.msra.mxu3 %v350_v40  ;;  %v1805_v63 = vld [vmem:[#allocation3 + $0xf8] sm:$0xff] }
  0x25   :  { %173 = vmatpush.msra.mxu0 %v146_v11  ;;  %1448 = vmatpush.msra.mxu2 %v146_v11 }
  0x26   :  { %360 = vmatpush.msra.mxu1 %v349_v41  ;;  %1458 = vmatpush.msra.mxu3 %v349_v41 }
  0x27   :  { %174 = vmatpush.msra.mxu0 %v145_v12  ;;  %1449 = vmatpush.msra.mxu2 %v145_v12 }
  0x28   :  { %361 = vmatpush.msra.mxu1 %v348_v42  ;;  %1459 = vmatpush.msra.mxu3 %v348_v42 }
  0x29   :  { %175 = vmatpush.msra.mxu0 %v144_v13  ;;  %1450 = vmatpush.msra.mxu2 %v144_v13 }
  0x2a   :  { %362 = vmatpush.msra.mxu1 %v347_v45  ;;  %1460 = vmatpush.msra.mxu3 %v347_v45 }
  0x2b   :  { %176 = vmatpush.msra.mxu0 %v143_v14  ;;  %1451 = vmatpush.msra.mxu2 %v143_v14 }
  0x2c   :  { %363 = vmatpush.msra.mxu1 %v346_v46  ;;  %1461 = vmatpush.msra.mxu3 %v346_v46 }
  0x2d   :  { %177 = vmatpush.msra.mxu0 %v142_v15  ;;  %1452 = vmatpush.msra.mxu2 %v142_v15 }
  0x2e   :  { %178 = vmatmul.f32.vlgmr.msra.gmra.mxu0 %v1713_v16  ;;  %226 = vmatmul.f32.vlgmr.msra.gmra.mxu2 %v1715_v17 }
  0x2f   :  { %364 = vmatpush.msra.mxu1 %v345_v47  ;;  %1462 = vmatpush.msra.mxu3 %v345_v47 }
  0x31   :  { %365 = vmatpush.msra.mxu1 %v344_v48  ;;  %1463 = vmatpush.msra.mxu3 %v344_v48 }
  0x33   :  { %366 = vmatpush.msra.mxu1 %v343_v51  ;;  %1464 = vmatpush.msra.mxu3 %v343_v51 }
  0x35   :  { %367 = vmatpush.msra.mxu1 %v342_v52  ;;  %1465 = vmatpush.msra.mxu3 %v342_v52 }
  0x36   :  { %181 = vmatmul.f32.gmra.mxu0 %v1719_v18  ;;  %229 = vmatmul.f32.gmra.mxu2 %v1721_v19 }
  0x37   :  { %368 = vmatpush.msra.mxu1 %v341_v53  ;;  %1466 = vmatpush.msra.mxu3 %v341_v53 }
  0x39   :  { %369 = vmatpush.msra.mxu1 %v340_v56  ;;  %1467 = vmatpush.msra.mxu3 %v340_v56 }
  0x3b   :  { %370 = vmatpush.msra.mxu1 %v339_v57  ;;  %1468 = vmatpush.msra.mxu3 %v339_v57 }
  0x3e   :  { %184 = vmatmul.f32.gmra.mxu0 %v1725_v20  ;;  %232 = vmatmul.f32.gmra.mxu2 %v1727_v21 }
  0x46   :  { %187 = vmatmul.f32.gmra.mxu0 %v1731_v22  ;;  %235 = vmatmul.f32.gmra.mxu2 %v1733_v23 }
  0x4e   :  { %190 = vmatmul.f32.gmra.mxu0 %v1737_v24  ;;  %238 = vmatmul.f32.gmra.mxu2 %v1739_v25 }
  0x56   :  { %193 = vmatmul.f32.gmra.mxu0 %v1743_v26  ;;  %241 = vmatmul.f32.gmra.mxu2 %v1745_v27 }
  0x5e   :  { %196 = vmatmul.f32.gmra.mxu0 %v1749_v28  ;;  %244 = vmatmul.f32.gmra.mxu2 %v1751_v29 }
  0x66   :  { %199 = vmatmul.f32.gmra.mxu0 %v1755_v30  ;;  %247 = vmatmul.f32.gmra.mxu2 %v1757_v31 }
  0x6e   :  { %202 = vmatmul.f32.gmra.mxu0 %v1761_v32  ;;  %250 = vmatmul.f32.gmra.mxu2 %v1763_v33 }
  0x76   :  { %205 = vmatmul.f32.gmra.mxu0 %v1767_v37  ;;  %253 = vmatmul.f32.gmra.mxu2 %v1769_v38 }
  0x7e   :  { %208 = vmatmul.f32.gmra.mxu0 %v1773_v43  ;;  %256 = vmatmul.f32.gmra.mxu2 %v1775_v44 }
  0x86   :  { %211 = vmatmul.f32.gmra.mxu0 %v1779_v49  ;;  %259 = vmatmul.f32.gmra.mxu2 %v1781_v50 }
  0x8e   :  { %214 = vmatmul.f32.gmra.mxu0 %v1785_v54  ;;  %262 = vmatmul.f32.gmra.mxu2 %v1787_v55 }
  0x96   :  { %217 = vmatmul.f32.gmra.mxu0 %v1791_v58  ;;  %265 = vmatmul.f32.gmra.mxu2 %v1793_v59 }
  0x9e   :  { %220 = vmatmul.f32.gmra.mxu0 %v1797_v60  ;;  %268 = vmatmul.f32.gmra.mxu2 %v1799_v61 }
  0xa6   :  { %223 = vmatmul.f32.gmra.mxu0 %v1803_v62  ;;  %271 = vmatmul.f32.gmra.mxu2 %v1805_v63 }
  0xab   :  { %v179_v1 = vpop.f32.mrf.mxu0 }
  0xac   :  { %v180_v2 = vadd.f32 %v1812_v0, %v179_v1 }
  0xae   :  { %v275_v3 = vmax.f32 %v180_v2, 0.0 }
  0xb0   :  { %371 = vmatmul.f32.vlgmr.msra.gmra.mxu1 %v275_v3 }
  0xb1   :  { %v227_v4 = vpop.f32.mrf.mxu2 }
  0xb2   :  { %v228_v5 = vadd.f32 %v1812_v0, %v227_v4 }
  0xb3   :  { %v182_v6 = vpop.f32.mrf.mxu0 }
  0xb4   :  { %v291_v7 = vmax.f32 %v228_v5, 0.0  ;;  %v183_v8 = vadd.f32 %v1812_v0, %v182_v6 }
  0xb6   :  { %v276_v9 = vmax.f32 %v183_v8, 0.0  ;;  %419 = vmatmul.f32.vlgmr.msra.gmra.mxu3 %v291_v7 }
  0xb8   :  { %374 = vmatmul.f32.gmra.mxu1 %v276_v9 }
  0xb9   :  { %v230_v10 = vpop.f32.mrf.mxu2 }
  0xba   :  { %v231_v11 = vadd.f32 %v1812_v0, %v230_v10 }
  0xbb   :  { %v185_v12 = vpop.f32.mrf.mxu0 }
  0xbc   :  { %v292_v13 = vmax.f32 %v231_v11, 0.0  ;;  %v186_v14 = vadd.f32 %v1812_v0, %v185_v12 }
  0xbe   :  { %v277_v15 = vmax.f32 %v186_v14, 0.0  ;;  %422 = vmatmul.f32.gmra.mxu3 %v292_v13 }
  0xc0   :  { %377 = vmatmul.f32.gmra.mxu1 %v277_v15 }
  0xc1   :  { %v233_v34 = vpop.f32.mrf.mxu2 }
  0xc2   :  { %v234_v35 = vadd.f32 %v1812_v0, %v233_v34 }
  0xc3   :  { %v188_v36 = vpop.f32.mrf.mxu0 }
  0xc4   :  { %v293_v39 = vmax.f32 %v234_v35, 0.0  ;;  %v189_v40 = vadd.f32 %v1812_v0, %v188_v36 }
  0xc6   :  { %v278_v41 = vmax.f32 %v189_v40, 0.0  ;;  %425 = vmatmul.f32.gmra.mxu3 %v293_v39 }
  0xc8   :  { %380 = vmatmul.f32.gmra.mxu1 %v278_v41 }
  0xc9   :  { %v236_v42 = vpop.f32.mrf.mxu2 }
  0xca   :  { %v237_v45 = vadd.f32 %v1812_v0, %v236_v42 }
  0xcb   :  { %v191_v46 = vpop.f32.mrf.mxu0 }
  0xcc   :  { %v294_v47 = vmax.f32 %v237_v45, 0.0  ;;  %v192_v48 = vadd.f32 %v1812_v0, %v191_v46 }
  0xce   :  { %v279_v51 = vmax.f32 %v192_v48, 0.0  ;;  %428 = vmatmul.f32.gmra.mxu3 %v294_v47 }
  0xd0   :  { %383 = vmatmul.f32.gmra.mxu1 %v279_v51 }
  0xd1   :  { %v239_v52 = vpop.f32.mrf.mxu2 }
  0xd2   :  { %v240_v53 = vadd.f32 %v1812_v0, %v239_v52 }
  0xd3   :  { %v194_v56 = vpop.f32.mrf.mxu0 }
  0xd4   :  { %v295_v57 = vmax.f32 %v240_v53, 0.0  ;;  %v195_v1 = vadd.f32 %v1812_v0, %v194_v56 }
  0xd6   :  { %v280_v2 = vmax.f32 %v195_v1, 0.0  ;;  %431 = vmatmul.f32.gmra.mxu3 %v295_v57 }
  0xd8   :  { %386 = vmatmul.f32.gmra.mxu1 %v280_v2 }
  0xd9   :  { %v242_v3 = vpop.f32.mrf.mxu2 }
  0xda   :  { %v243_v4 = vadd.f32 %v1812_v0, %v242_v3 }
  0xdb   :  { %v197_v5 = vpop.f32.mrf.mxu0 }
  0xdc   :  { %v296_v6 = vmax.f32 %v243_v4, 0.0  ;;  %v198_v7 = vadd.f32 %v1812_v0, %v197_v5 }
  0xde   :  { %v281_v8 = vmax.f32 %v198_v7, 0.0  ;;  %434 = vmatmul.f32.gmra.mxu3 %v296_v6 }
  0xe0   :  { %389 = vmatmul.f32.gmra.mxu1 %v281_v8 }
  0xe1   :  { %v245_v9 = vpop.f32.mrf.mxu2 }
  0xe2   :  { %v246_v10 = vadd.f32 %v1812_v0, %v245_v9 }
  0xe3   :  { %v200_v11 = vpop.f32.mrf.mxu0 }
  0xe4   :  { %v297_v12 = vmax.f32 %v246_v10, 0.0  ;;  %v201_v13 = vadd.f32 %v1812_v0, %v200_v11 }
  0xe6   :  { %v282_v14 = vmax.f32 %v201_v13, 0.0  ;;  %437 = vmatmul.f32.gmra.mxu3 %v297_v12 }
  0xe8   :  { %392 = vmatmul.f32.gmra.mxu1 %v282_v14 }
  0xe9   :  { %v248_v15 = vpop.f32.mrf.mxu2 }
  0xea   :  { %v249_v34 = vadd.f32 %v1812_v0, %v248_v15 }
  0xeb   :  { %v203_v35 = vpop.f32.mrf.mxu0 }
  0xec   :  { %v298_v36 = vmax.f32 %v249_v34, 0.0  ;;  %v204_v39 = vadd.f32 %v1812_v0, %v203_v35 }
  0xee   :  { %v283_v40 = vmax.f32 %v204_v39, 0.0  ;;  %440 = vmatmul.f32.gmra.mxu3 %v298_v36 }
  0xf0   :  { %395 = vmatmul.f32.gmra.mxu1 %v283_v40 }
  0xf1   :  { %v251_v41 = vpop.f32.mrf.mxu2 }
  0xf2   :  { %v252_v42 = vadd.f32 %v1812_v0, %v251_v41 }
  0xf3   :  { %v206_v45 = vpop.f32.mrf.mxu0 }
  0xf4   :  { %v299_v46 = vmax.f32 %v252_v42, 0.0  ;;  %v207_v47 = vadd.f32 %v1812_v0, %v206_v45 }
  0xf6   :  { %v284_v48 = vmax.f32 %v207_v47, 0.0  ;;  %443 = vmatmul.f32.gmra.mxu3 %v299_v46 }
  0xf8   :  { %398 = vmatmul.f32.gmra.mxu1 %v284_v48 }
  0xf9   :  { %v254_v51 = vpop.f32.mrf.mxu2 }
  0xfa   :  { %v255_v52 = vadd.f32 %v1812_v0, %v254_v51 }
  0xfb   :  { %v209_v53 = vpop.f32.mrf.mxu0 }
  0xfc   :  { %v300_v56 = vmax.f32 %v255_v52, 0.0  ;;  %v210_v57 = vadd.f32 %v1812_v0, %v209_v53 }
  0xfe   :  { %v285_v1 = vmax.f32 %v210_v57, 0.0  ;;  %446 = vmatmul.f32.gmra.mxu3 %v300_v56 }
 0x100   :  { %401 = vmatmul.f32.gmra.mxu1 %v285_v1 }
 0x101   :  { %v257_v2 = vpop.f32.mrf.mxu2 }
 0x102   :  { %v258_v3 = vadd.f32 %v1812_v0, %v257_v2 }
 0x103   :  { %v212_v4 = vpop.f32.mrf.mxu0 }
 0x104   :  { %v301_v5 = vmax.f32 %v258_v3, 0.0  ;;  %v213_v6 = vadd.f32 %v1812_v0, %v212_v4  ;;  %v1849_v3 = vld [vmem:[%s2496_s4] ss:$0 sm:$0xff] }
 0x106   :  { %v286_v7 = vmax.f32 %v213_v6, 0.0  ;;  %449 = vmatmul.f32.gmra.mxu3 %v301_v5 }
 0x108   :  { %404 = vmatmul.f32.gmra.mxu1 %v286_v7 }
 0x109   :  { %v260_v8 = vpop.f32.mrf.mxu2 }
 0x10a   :  { %v261_v9 = vadd.f32 %v1812_v0, %v260_v8 }
 0x10b   :  { %v215_v10 = vpop.f32.mrf.mxu0 }
 0x10c   :  { %v302_v11 = vmax.f32 %v261_v9, 0.0  ;;  %v216_v12 = vadd.f32 %v1812_v0, %v215_v10 }
 0x10e   :  { %v287_v13 = vmax.f32 %v216_v12, 0.0  ;;  %452 = vmatmul.f32.gmra.mxu3 %v302_v11 }
 0x110   :  { %407 = vmatmul.f32.gmra.mxu1 %v287_v13 }
 0x111   :  { %v263_v14 = vpop.f32.mrf.mxu2 }
 0x112   :  { %v264_v15 = vadd.f32 %v1812_v0, %v263_v14 }
 0x113   :  { %v218_v34 = vpop.f32.mrf.mxu0 }
 0x114   :  { %v303_v35 = vmax.f32 %v264_v15, 0.0  ;;  %v219_v36 = vadd.f32 %v1812_v0, %v218_v34 }
 0x116   :  { %v288_v39 = vmax.f32 %v219_v36, 0.0  ;;  %455 = vmatmul.f32.gmra.mxu3 %v303_v35 }
 0x118   :  { %410 = vmatmul.f32.gmra.mxu1 %v288_v39 }
 0x119   :  { %v266_v40 = vpop.f32.mrf.mxu2 }
 0x11a   :  { %v267_v41 = vadd.f32 %v1812_v0, %v266_v40 }
 0x11b   :  { %v221_v42 = vpop.f32.mrf.mxu0 }
 0x11c   :  { %v304_v45 = vmax.f32 %v267_v41, 0.0  ;;  %v222_v46 = vadd.f32 %v1812_v0, %v221_v42 }
 0x11e   :  { %v289_v47 = vmax.f32 %v222_v46, 0.0  ;;  %458 = vmatmul.f32.gmra.mxu3 %v304_v45 }
 0x120   :  { %413 = vmatmul.f32.gmra.mxu1 %v289_v47 }
 0x121   :  { %v269_v48 = vpop.f32.mrf.mxu2 }
 0x122   :  { %v270_v51 = vadd.f32 %v1812_v0, %v269_v48 }
 0x123   :  { %v224_v52 = vpop.f32.mrf.mxu0 }
 0x124   :  { %v305_v53 = vmax.f32 %v270_v51, 0.0  ;;  %v225_v56 = vadd.f32 %v1812_v0, %v224_v52 }
 0x126   :  { %v290_v57 = vmax.f32 %v225_v56, 0.0  ;;  %461 = vmatmul.f32.gmra.mxu3 %v305_v53 }
 0x128   :  { %416 = vmatmul.f32.gmra.mxu1 %v290_v57 }
 0x129   :  { %v272_v1 = vpop.f32.mrf.mxu2 }
 0x12a   :  { %v273_v2 = vadd.f32 %v1812_v0, %v272_v1 }
 0x12c   :  { %v306_v4 = vmax.f32 %v273_v2, 0.0 }
 0x12d   :  { %v372_v5 = vpop.f32.mrf.mxu1 }
 0x12e   :  { %v571_v6 = vadd.f32 %v1849_v3, %v372_v5  ;;  %464 = vmatmul.f32.gmra.mxu3 %v306_v4 }
 0x130   :  { %v1853_v7 = vadd.f32 %v571_v6, %v1713_v16 }
 0x132   :  { %640 = vadd.xlane.f32.xlu0 %v1853_v7 }
 0x135   :  { %v375_v8 = vpop.f32.mrf.mxu1 }
 0x136   :  { %v572_v9 = vadd.f32 %v1849_v3, %v375_v8 }
 0x138   :  { %v1858_v0 = vadd.f32 %v572_v9, %v1719_v18 }
 0x139   :  { %v420_v10 = vpop.f32.mrf.mxu3 }
 0x13a   :  { %v587_v11 = vadd.f32 %v1849_v3, %v420_v10  ;;  %642 = vadd.xlane.f32.xlu0 %v1858_v0 }
 0x13c   :  { %v1863_v12 = vadd.f32 %v587_v11, %v1715_v17 }
 0x13d   :  { %v378_v13 = vpop.f32.mrf.mxu1 }
 0x13e   :  { %v573_v16 = vadd.f32 %v1849_v3, %v378_v13  ;;  %672 = vadd.xlane.f32.xlu1 %v1863_v12 }
 0x140   :  { %v1869_v34 = vadd.f32 %v573_v16, %v1725_v20 }
 0x141   :  { %v423_v14 = vpop.f32.mrf.mxu3 }
 0x142   :  { %v588_v15 = vadd.f32 %v1849_v3, %v423_v14 }
 0x144   :  { %v1872_v18 = vadd.f32 %v588_v15, %v1721_v19 }
 0x145   :  { %v381_v35 = vpop.f32.mrf.mxu1 }
 0x146   :  { %v574_v36 = vadd.f32 %v1849_v3, %v381_v35  ;;  %674 = vadd.xlane.f32.xlu2 %v1872_v18  ;;  %644 = vadd.xlane.f32.xlu1 %v1869_v34 }
 0x148   :  { %v1879_v40 = vadd.f32 %v574_v36, %v1731_v22 }
 0x149   :  { %v426_v17 = vpop.f32.mrf.mxu3 }
 0x14a   :  { %v589_v39 = vadd.f32 %v1849_v3, %v426_v17 }
 0x14c   :  { %v1882_v41 = vadd.f32 %v589_v39, %v1727_v21 }
 0x14d   :  { %v384_v20 = vpop.f32.mrf.mxu1 }
 0x14e   :  { %v575_v19 = vadd.f32 %v1849_v3, %v384_v20  ;;  %676 = vadd.xlane.f32.xlu0 %v1882_v41  ;;  %646 = vadd.xlane.f32.xlu1 %v1879_v40 }
 0x150   :  { %v1888_v42 = vadd.f32 %v575_v19, %v1737_v24 }
 0x151   :  { %v429_v45 = vpop.f32.mrf.mxu3 }
 0x152   :  { %v590_v46 = vadd.f32 %v1849_v3, %v429_v45  ;;  %648 = vadd.xlane.f32.xlu2 %v1888_v42 }
 0x154   :  { %v1893_v22 = vadd.f32 %v590_v46, %v1733_v23 }
 0x155   :  { %v387_v21 = vpop.f32.mrf.mxu1 }
 0x156   :  { %v576_v47 = vadd.f32 %v1849_v3, %v387_v21  ;;  %678 = vadd.xlane.f32.xlu1 %v1893_v22 }
 0x158   :  { %v1898_v48 = vadd.f32 %v576_v47, %v1743_v26 }
 0x159   :  { %v432_v51 = vpop.f32.mrf.mxu3 }
 0x15a   :  { %650 = vadd.xlane.f32.xlu2 %v1898_v48  ;;  %v591_v24 = vadd.f32 %v1849_v3, %v432_v51 }
 0x15c   :  { %v1904_v56 = vadd.f32 %v591_v24, %v1739_v25 }
 0x15d   :  { %v390_v52 = vpop.f32.mrf.mxu1 }
 0x15e   :  { %v577_v53 = vadd.f32 %v1849_v3, %v390_v52 }
 0x160   :  { %v1907_v23 = vadd.f32 %v577_v53, %v1749_v28 }
 0x161   :  { %v435_v57 = vpop.f32.mrf.mxu3 }
 0x162   :  { %680 = vadd.xlane.f32.xlu2 %v1904_v56  ;;  %652 = vadd.xlane.f32.xlu0 %v1907_v23  ;;  %v592_v26 = vadd.f32 %v1849_v3, %v435_v57 }
 0x164   :  { %v1914_v4 = vadd.f32 %v592_v26, %v1745_v27 }
 0x165   :  { %v393_v1 = vpop.f32.mrf.mxu1 }
 0x166   :  { %v578_v2 = vadd.f32 %v1849_v3, %v393_v1 }
 0x168   :  { %v1917_v5 = vadd.f32 %v578_v2, %v1755_v30  ;;  %v635_v2 = vlaneseq }
 0x169   :  { %v438_v25 = vpop.f32.mrf.mxu3 }
 0x16a   :  { %682 = vadd.xlane.f32.xlu0 %v1914_v4  ;;  %654 = vadd.xlane.f32.xlu1 %v1917_v5  ;;  %v593_v28 = vadd.f32 %v1849_v3, %v438_v25 }
 0x16c   :  { %v1924_v9 = vadd.f32 %v593_v28, %v1751_v29 }
 0x16d   :  { %v396_v6 = vpop.f32.mrf.mxu1 }
 0x16e   :  { %v579_v8 = vadd.f32 %v1849_v3, %v396_v6 }
 0x170   :  { %v1927_v10 = vadd.f32 %v579_v8, %v1761_v32 }
 0x171   :  { %v441_v27 = vpop.f32.mrf.mxu3 }
 0x172   :  { %684 = vadd.xlane.f32.xlu1 %v1924_v9  ;;  %656 = vadd.xlane.f32.xlu2 %v1927_v10  ;;  %v594_v30 = vadd.f32 %v1849_v3, %v441_v27 }
 0x174   :  { %v1934_v16 = vadd.f32 %v594_v30, %v1757_v31 }
 0x175   :  { %v399_v11 = vpop.f32.mrf.mxu1 }
 0x176   :  { %v580_v13 = vadd.f32 %v1849_v3, %v399_v11 }
 0x178   :  { %v1937_v14 = vadd.f32 %v580_v13, %v1767_v37 }
 0x179   :  { %v444_v29 = vpop.f32.mrf.mxu3 }
 0x17a   :  { %686 = vadd.xlane.f32.xlu2 %v1934_v16  ;;  %658 = vadd.xlane.f32.xlu0 %v1937_v14  ;;  %v595_v32 = vadd.f32 %v1849_v3, %v444_v29 }
 0x17c   :  { %v1944_v36 = vadd.f32 %v595_v32, %v1763_v33  ;;  %v1653_v32 = vmov 0.0  }
 0x17d   :  { %v402_v15 = vpop.f32.mrf.mxu1 }
 0x17e   :  { %v581_v35 = vadd.f32 %v1849_v3, %v402_v15 }
 0x180   :  { %v1947_v17 = vadd.f32 %v581_v35, %v1773_v43 }
 0x181   :  { %v447_v31 = vpop.f32.mrf.mxu3 }
 0x182   :  { %688 = vadd.xlane.f32.xlu0 %v1944_v36  ;;  %660 = vadd.xlane.f32.xlu1 %v1947_v17  ;;  %v596_v37 = vadd.f32 %v1849_v3, %v447_v31 }
 0x184   :  { %v1954_v19 = vadd.f32 %v596_v37, %v1769_v38 }
 0x185   :  { %v405_v39 = vpop.f32.mrf.mxu1 }
 0x186   :  { %v582_v20 = vadd.f32 %v1849_v3, %v405_v39 }
 0x188   :  { %v1957_v45 = vadd.f32 %v582_v20, %v1779_v49 }
 0x189   :  { %v450_v33 = vpop.f32.mrf.mxu3 }
 0x18a   :  { %690 = vadd.xlane.f32.xlu1 %v1954_v19  ;;  %662 = vadd.xlane.f32.xlu2 %v1957_v45  ;;  %v597_v43 = vadd.f32 %v1849_v3, %v450_v33 }
 0x18c   :  { %v1964_v47 = vadd.f32 %v597_v43, %v1775_v44 }
 0x18d   :  { %v408_v46 = vpop.f32.mrf.mxu1 }
 0x18e   :  { %v583_v21 = vadd.f32 %v1849_v3, %v408_v46 }
 0x190   :  { %v1967_v51 = vadd.f32 %v583_v21, %v1785_v54 }
 0x191   :  { %v453_v38 = vpop.f32.mrf.mxu3 }
 0x192   :  { %692 = vadd.xlane.f32.xlu2 %v1964_v47  ;;  %664 = vadd.xlane.f32.xlu0 %v1967_v51  ;;  %v598_v49 = vadd.f32 %v1849_v3, %v453_v38 }
 0x194   :  { %v1974_v53 = vadd.f32 %v598_v49, %v1781_v50 }
 0x195   :  { %v411_v24 = vpop.f32.mrf.mxu1 }
 0x196   :  { %v584_v52 = vadd.f32 %v1849_v3, %v411_v24 }
 0x198   :  { %v1977_v57 = vadd.f32 %v584_v52, %v1791_v58  ;;  %v636_v58 = vand.u32 127, %v635_v2 }
 0x199   :  { %v456_v44 = vpop.f32.mrf.mxu3 }
 0x19a   :  { %694 = vadd.xlane.f32.xlu0 %v1974_v53  ;;  %666 = vadd.xlane.f32.xlu1 %v1977_v57  ;;  %v599_v54 = vadd.f32 %v1849_v3, %v456_v44  ;;  %vm637_vm0 = vcmp.lt.s32.totalorder %v636_v58, 32 }
 0x19b   :  { %v2000_v15 = vsel %vm637_vm0, 1.0, %v1653_v32 }
 0x19c   :  { %v1984_v25 = vadd.f32 %v599_v54, %v1787_v55 }
 0x19d   :  { %v414_v26 = vpop.f32.mrf.mxu1 }
 0x19e   :  { %v585_v1 = vadd.f32 %v1849_v3, %v414_v26 }
 0x1a0   :  { %v1987_v50 = vadd.f32 %v585_v1, %v1797_v60 }
 0x1a1   :  { %v459_v28 = vpop.f32.mrf.mxu3 }
 0x1a2   :  { %696 = vadd.xlane.f32.xlu1 %v1984_v25  ;;  %668 = vadd.xlane.f32.xlu2 %v1987_v50  ;;  %v600_v6 = vadd.f32 %v1849_v3, %v459_v28 }
 0x1a4   :  { %v1995_v13 = vadd.f32 %v600_v6, %v1793_v59 }
 0x1a5   :  { %v641_v8 = vpop.xlane.xlu0 %640  ;;  %v417_v27 = vpop.f32.mrf.mxu1 }
 0x1a6   :  { %v704_v30 = vmul.f32 0.03125, %v641_v8  ;;  %v586_v11 = vadd.f32 %v1849_v3, %v417_v27 }
 0x1a8   :  { %v736_v55 = vsub.f32 %v1853_v7, %v704_v30  ;;  %v1998_v60 = vadd.f32 %v586_v11, %v1803_v62 }
 0x1a9   :  { %v462_v29 = vpop.f32.mrf.mxu3 }
 0x1aa   :  { %698 = vadd.xlane.f32.xlu2 %v1995_v13  ;;  %670 = vadd.xlane.f32.xlu0 %v1998_v60  ;;  %v601_v35 = vadd.f32 %v1849_v3, %v462_v29  ;;  %v2006_v31 = vmul.f32 %v2000_v15, %v736_v55 }
 0x1ac   :  { %v800_v62 = vmul.f32 %v2006_v31, %v2006_v31  ;;  %v2012_v39 = vadd.f32 %v601_v35, %v1799_v61 }
 0x1ad   :  { %v643_v7 = vpop.xlane.xlu0 %642 }
 0x1ae   :  { %v705_v37 = vmul.f32 0.03125, %v643_v7 }
 0x1b0   :  { %v737_v59 = vsub.f32 %v1858_v0, %v705_v37 }
 0x1b1   :  { %v673_v20 = vpop.xlane.xlu1 %672  ;;  %v465_v33 = vpop.f32.mrf.mxu3 }
 0x1b2   :  { %v602_v43 = vadd.f32 %v1849_v3, %v465_v33  ;;  %832 = vadd.xlane.f32.xlu2 %v800_v62  ;;  %700 = vadd.xlane.f32.xlu0 %v2012_v39  ;;  %v720_v46 = vmul.f32 0.03125, %v673_v20  ;;  %v2020_v38 = vmul.f32 %v2000_v15, %v737_v59 }
 0x1b4   :  { %v2017_v21 = vadd.f32 %v602_v43, %v1805_v63  ;;  %v752_v0 = vsub.f32 %v1863_v12, %v720_v46  ;;  %v801_v61 = vmul.f32 %v2020_v38, %v2020_v38 }
 0x1b6   :  { %702 = vadd.xlane.f32.xlu1 %v2017_v21  ;;  %v2028_v63 = vmul.f32 %v2000_v15, %v752_v0 }
 0x1b8   :  { %v816_v1 = vmul.f32 %v2028_v63, %v2028_v63 }
 0x1b9   :  { %v675_v49 = vpop.xlane.xlu2 %674  ;;  %v645_v24 = vpop.xlane.xlu1 %644 }
 0x1ba   :  { %v706_v3 = vmul.f32 0.03125, %v645_v24  ;;  %834 = vadd.xlane.f32.xlu0 %v801_v61  ;;  %v721_v52 = vmul.f32 0.03125, %v675_v49 }
 0x1bc   :  { %v738_v44 = vsub.f32 %v1869_v34, %v706_v3  ;;  %v753_v26 = vsub.f32 %v1872_v18, %v721_v52 }
 0x1be   :  { %v2031_v54 = vmul.f32 %v2000_v15, %v738_v44  ;;  %v2040_v8 = vmul.f32 %v2000_v15, %v753_v26 }
 0x1c0   :  { %v802_v12 = vmul.f32 %v2031_v54, %v2031_v54  ;;  %v817_v29 = vmul.f32 %v2040_v8, %v2040_v8 }
 0x1c1   :  { %v677_v2 = vpop.xlane.xlu0 %676  ;;  %v647_v28 = vpop.xlane.xlu1 %646 }
 0x1c2   :  { %v707_v58 = vmul.f32 0.03125, %v647_v28  ;;  %836 = vadd.xlane.f32.xlu1 %v802_v12  ;;  %864 = vadd.xlane.f32.xlu0 %v816_v1  ;;  %v722_v34 = vmul.f32 0.03125, %v677_v2 }
 0x1c4   :  { %v739_v6 = vsub.f32 %v1879_v40, %v707_v58  ;;  %v754_v11 = vsub.f32 %v1882_v41, %v722_v34 }
 0x1c5   :  { %v649_v27 = vpop.xlane.xlu2 %648 }
 0x1c6   :  { %v708_v30 = vmul.f32 0.03125, %v649_v27  ;;  %v2043_v18 = vmul.f32 %v2000_v15, %v739_v6 }
 0x1c8   :  { %v740_v55 = vsub.f32 %v1888_v42, %v708_v30  ;;  %v803_v32 = vmul.f32 %v2043_v18, %v2043_v18  ;;  %v2058_v42 = vmul.f32 %v2000_v15, %v754_v11 }
 0x1c9   :  { %v679_v35 = vpop.xlane.xlu1 %678 }
 0x1ca   :  { %v723_v40 = vmul.f32 0.03125, %v679_v35  ;;  %866 = vadd.xlane.f32.xlu1 %v817_v29  ;;  %838 = vadd.xlane.f32.xlu2 %v803_v32  ;;  %v2052_v7 = vmul.f32 %v2000_v15, %v740_v55  ;;  %v818_v33 = vmul.f32 %v2058_v42, %v2058_v42 }
 0x1cc   :  { %v755_v37 = vsub.f32 %v1893_v22, %v723_v40  ;;  %v804_v41 = vmul.f32 %v2052_v7, %v2052_v7 }
 0x1cd   :  { %v651_v59 = vpop.xlane.xlu2 %650 }
 0x1ce   :  { %v709_v62 = vmul.f32 0.03125, %v651_v59  ;;  %840 = vadd.xlane.f32.xlu0 %v804_v41  ;;  %v2064_v43 = vmul.f32 %v2000_v15, %v755_v37 }
 0x1d0   :  { %v741_v20 = vsub.f32 %v1898_v48, %v709_v62  ;;  %v819_v0 = vmul.f32 %v2064_v43, %v2064_v43 }
 0x1d2   :  { %868 = vadd.xlane.f32.xlu2 %v818_v33  ;;  %v2067_v22 = vmul.f32 %v2000_v15, %v741_v20 }
 0x1d4   :  { %v805_v46 = vmul.f32 %v2067_v22, %v2067_v22 }
 0x1d5   :  { %v681_v61 = vpop.xlane.xlu2 %680  ;;  %v653_v49 = vpop.xlane.xlu0 %652 }
 0x1d6   :  { %v724_v24 = vmul.f32 0.03125, %v681_v61  ;;  %v710_v48 = vmul.f32 0.03125, %v653_v49  ;;  %842 = vadd.xlane.f32.xlu1 %v805_v46  ;;  %870 = vadd.xlane.f32.xlu0 %v819_v0 }
 0x1d8   :  { %v756_v3 = vsub.f32 %v1904_v56, %v724_v24  ;;  %v742_v52 = vsub.f32 %v1907_v23, %v710_v48 }
 0x1da   :  { %v2076_v44 = vmul.f32 %v2000_v15, %v756_v3  ;;  %v2079_v26 = vmul.f32 %v2000_v15, %v742_v52 }
 0x1dc   :  { %v820_v12 = vmul.f32 %v2076_v44, %v2076_v44  ;;  %v806_v1 = vmul.f32 %v2079_v26, %v2079_v26 }
 0x1dd   :  { %v683_v2 = vpop.xlane.xlu0 %682  ;;  %v655_v28 = vpop.xlane.xlu1 %654 }
 0x1de   :  { %v725_v58 = vmul.f32 0.03125, %v683_v2  ;;  %v711_v34 = vmul.f32 0.03125, %v655_v28  ;;  %872 = vadd.xlane.f32.xlu1 %v820_v12  ;;  %844 = vadd.xlane.f32.xlu2 %v806_v1 }
 0x1e0   :  { %v757_v56 = vsub.f32 %v1914_v4, %v725_v58  ;;  %v743_v23 = vsub.f32 %v1917_v5, %v711_v34 }
 0x1e2   :  { %v2088_v6 = vmul.f32 %v2000_v15, %v757_v56  ;;  %v2091_v27 = vmul.f32 %v2000_v15, %v743_v23 }
 0x1e4   :  { %v821_v30 = vmul.f32 %v2088_v6, %v2088_v6  ;;  %v807_v11 = vmul.f32 %v2091_v27, %v2091_v27 }
 0x1e5   :  { %v685_v55 = vpop.xlane.xlu1 %684  ;;  %v657_v29 = vpop.xlane.xlu2 %656 }
 0x1e6   :  { %v726_v32 = vmul.f32 0.03125, %v685_v55  ;;  %v712_v35 = vmul.f32 0.03125, %v657_v29  ;;  %874 = vadd.xlane.f32.xlu2 %v821_v30  ;;  %846 = vadd.xlane.f32.xlu0 %v807_v11 }
 0x1e8   :  { %v758_v4 = vsub.f32 %v1924_v9, %v726_v32  ;;  %v744_v5 = vsub.f32 %v1927_v10, %v712_v35 }
 0x1ea   :  { %v2100_v40 = vmul.f32 %v2000_v15, %v744_v5  ;;  %v2103_v37 = vmul.f32 %v2000_v15, %v758_v4 }
 0x1ec   :  { %v808_v41 = vmul.f32 %v2100_v40, %v2100_v40  ;;  %v822_v59 = vmul.f32 %v2103_v37, %v2103_v37 }
 0x1ed   :  { %v687_v62 = vpop.xlane.xlu2 %686  ;;  %v659_v20 = vpop.xlane.xlu0 %658 }
 0x1ee   :  { %v727_v33 = vmul.f32 0.03125, %v687_v62  ;;  %v713_v46 = vmul.f32 0.03125, %v659_v20  ;;  %848 = vadd.xlane.f32.xlu1 %v808_v41  ;;  %876 = vadd.xlane.f32.xlu0 %v822_v59 }
 0x1f0   :  { %v759_v9 = vsub.f32 %v1934_v16, %v727_v33  ;;  %v745_v10 = vsub.f32 %v1937_v14, %v713_v46 }
 0x1f2   :  { %v2112_v0 = vmul.f32 %v2000_v15, %v759_v9  ;;  %v2115_v61 = vmul.f32 %v2000_v15, %v745_v10 }
 0x1f4   :  { %v823_v49 = vmul.f32 %v2112_v0, %v2112_v0  ;;  %v809_v24 = vmul.f32 %v2115_v61, %v2115_v61 }
 0x1f5   :  { %v689_v48 = vpop.xlane.xlu0 %688  ;;  %v661_v3 = vpop.xlane.xlu1 %660 }
 0x1f6   :  { %v728_v52 = vmul.f32 0.03125, %v689_v48  ;;  %v714_v12 = vmul.f32 0.03125, %v661_v3  ;;  %878 = vadd.xlane.f32.xlu1 %v823_v49  ;;  %850 = vadd.xlane.f32.xlu2 %v809_v24 }
 0x1f8   :  { %v760_v16 = vsub.f32 %v1944_v36, %v728_v52  ;;  %v746_v14 = vsub.f32 %v1947_v17, %v714_v12 }
 0x1fa   :  { %v2124_v1 = vmul.f32 %v2000_v15, %v760_v16  ;;  %v2127_v2 = vmul.f32 %v2000_v15, %v746_v14 }
 0x1fc   :  { %v824_v28 = vmul.f32 %v2124_v1, %v2124_v1  ;;  %v810_v58 = vmul.f32 %v2127_v2, %v2127_v2 }
 0x1fd   :  { %v691_v34 = vpop.xlane.xlu1 %690  ;;  %v663_v56 = vpop.xlane.xlu2 %662 }
 0x1fe   :  { %v729_v23 = vmul.f32 0.03125, %v691_v34  ;;  %v715_v30 = vmul.f32 0.03125, %v663_v56  ;;  %880 = vadd.xlane.f32.xlu2 %v824_v28  ;;  %852 = vadd.xlane.f32.xlu0 %v810_v58 }
 0x200   :  { %v761_v36 = vsub.f32 %v1954_v19, %v729_v23  ;;  %v747_v17 = vsub.f32 %v1957_v45, %v715_v30 }
 0x202   :  { %v2136_v11 = vmul.f32 %v2000_v15, %v747_v17  ;;  %v2139_v55 = vmul.f32 %v2000_v15, %v761_v36 }
 0x204   :  { %v811_v29 = vmul.f32 %v2136_v11, %v2136_v11  ;;  %v825_v32 = vmul.f32 %v2139_v55, %v2139_v55 }
 0x205   :  { %v693_v35 = vpop.xlane.xlu2 %692  ;;  %v665_v4 = vpop.xlane.xlu0 %664 }
 0x206   :  { %v730_v5 = vmul.f32 0.03125, %v693_v35  ;;  %v716_v41 = vmul.f32 0.03125, %v665_v4  ;;  %854 = vadd.xlane.f32.xlu1 %v811_v29  ;;  %882 = vadd.xlane.f32.xlu0 %v825_v32 }
 0x208   :  { %v762_v19 = vsub.f32 %v1964_v47, %v730_v5  ;;  %v748_v45 = vsub.f32 %v1967_v51, %v716_v41 }
 0x20a   :  { %v2148_v59 = vmul.f32 %v2000_v15, %v762_v19  ;;  %v2151_v62 = vmul.f32 %v2000_v15, %v748_v45 }
 0x20c   :  { %v826_v20 = vmul.f32 %v2148_v59, %v2148_v59  ;;  %v812_v33 = vmul.f32 %v2151_v62, %v2151_v62 }
 0x20d   :  { %v695_v46 = vpop.xlane.xlu0 %694  ;;  %v667_v9 = vpop.xlane.xlu1 %666 }
 0x20e   :  { %v731_v10 = vmul.f32 0.03125, %v695_v46  ;;  %v717_v49 = vmul.f32 0.03125, %v667_v9  ;;  %884 = vadd.xlane.f32.xlu1 %v826_v20  ;;  %856 = vadd.xlane.f32.xlu2 %v812_v33 }
 0x210   :  { %v763_v47 = vsub.f32 %v1974_v53, %v731_v10  ;;  %v749_v51 = vsub.f32 %v1977_v57, %v717_v49 }
 0x212   :  { %v2160_v24 = vmul.f32 %v2000_v15, %v763_v47  ;;  %v2163_v48 = vmul.f32 %v2000_v15, %v749_v51 }
 0x214   :  { %v827_v3 = vmul.f32 %v2160_v24, %v2160_v24  ;;  %v813_v52 = vmul.f32 %v2163_v48, %v2163_v48 }
 0x215   :  { %v697_v12 = vpop.xlane.xlu1 %696  ;;  %v669_v16 = vpop.xlane.xlu2 %668 }
 0x216   :  { %v732_v14 = vmul.f32 0.03125, %v697_v12  ;;  %v718_v28 = vmul.f32 0.03125, %v669_v16  ;;  %886 = vadd.xlane.f32.xlu2 %v827_v3  ;;  %858 = vadd.xlane.f32.xlu0 %v813_v52 }
 0x218   :  { %v764_v53 = vsub.f32 %v1984_v25, %v732_v14  ;;  %v750_v57 = vsub.f32 %v1987_v50, %v718_v28 }
 0x21a   :  { %v2172_v58 = vmul.f32 %v2000_v15, %v750_v57  ;;  %v2175_v34 = vmul.f32 %v2000_v15, %v764_v53 }
 0x21c   :  { %v814_v56 = vmul.f32 %v2172_v58, %v2172_v58  ;;  %v828_v23 = vmul.f32 %v2175_v34, %v2175_v34 }
 0x21d   :  { %v699_v30 = vpop.xlane.xlu2 %698  ;;  %v671_v36 = vpop.xlane.xlu0 %670 }
 0x21e   :  { %v733_v17 = vmul.f32 0.03125, %v699_v30  ;;  %v719_v29 = vmul.f32 0.03125, %v671_v36  ;;  %860 = vadd.xlane.f32.xlu1 %v814_v56  ;;  %888 = vadd.xlane.f32.xlu0 %v828_v23 }
 0x220   :  { %v765_v25 = vsub.f32 %v1995_v13, %v733_v17  ;;  %v751_v50 = vsub.f32 %v1998_v60, %v719_v29 }
 0x222   :  { %v2184_v32 = vmul.f32 %v2000_v15, %v765_v25  ;;  %v2187_v35 = vmul.f32 %v2000_v15, %v751_v50  ;;  %v2210_v25 = vld [vmem:[%s2497_s5] ss:$0 sm:$0xff] }
 0x224   :  { %v829_v4 = vmul.f32 %v2184_v32, %v2184_v32  ;;  %v815_v5 = vmul.f32 %v2187_v35, %v2187_v35 }
 0x225   :  { %v833_v41 = vpop.xlane.xlu2 %832  ;;  %v701_v19 = vpop.xlane.xlu0 %700 }
 0x226   :  { %v896_v45 = vmul.f32 0.03125, %v833_v41  ;;  %v734_v20 = vmul.f32 0.03125, %v701_v19  ;;  %890 = vadd.xlane.f32.xlu1 %v829_v4  ;;  %862 = vadd.xlane.f32.xlu2 %v815_v5  ;;  %v2216_v5 = vld [vmem:[%s2498_s6] ss:$0 sm:$0xff] }
 0x228   :  { %v928_v13 = vadd.f32 1e-12, %v896_v45  ;;  %v766_v60 = vsub.f32 %v2012_v39, %v734_v20 }
 0x229   :  { %v703_v33 = vpop.xlane.xlu1 %702 }
 0x22a   :  { %1480 = vrsqrt.f32 %v928_v13  ;;  %v735_v46 = vmul.f32 0.03125, %v703_v33  ;;  %v2195_v9 = vmul.f32 %v2000_v15, %v766_v60  ;;  %vm966_vm2 = vweird.f32 %v928_v13 }
 0x22c   :  { %v767_v10 = vsub.f32 %v2017_v21, %v735_v46  ;;  %v830_v49 = vmul.f32 %v2195_v9, %v2195_v9 }
 0x22d   :  { %v835_v47 = vpop.xlane.xlu0 %834 }
 0x22e   :  { %v897_v51 = vmul.f32 0.03125, %v835_v47  ;;  %892 = vadd.xlane.f32.xlu2 %v830_v49  ;;  %v2201_v3 = vmul.f32 %v2000_v15, %v767_v10 }
 0x230   :  { %v1481_v52 = vpop.eup %1480  ;;  %v929_v12 = vadd.f32 1e-12, %v897_v51  ;;  %v831_v39 = vmul.f32 %v2201_v3, %v2201_v3 }
 0x231   :  { %v961_v16 = vmul.f32 %v1481_v52, %v928_v13  ;;  %vm967_vm1 = vweird.f32 %v1481_v52 }
 0x232   :  { %1482 = vrsqrt.f32 %v929_v12  ;;  %894 = vadd.xlane.f32.xlu0 %v831_v39  ;;  %vm968_vm3 = vmor %vm966_vm2, %vm967_vm1  ;;  %vm976_vm5 = vweird.f32 %v929_v12 }
 0x233   :  { %v962_v14 = vmul.f32 %v1481_v52, %v961_v16 }
 0x235   :  { %v963_v28 = vmul.f32 0.5, %v962_v14  ;;  %v837_v21 = vpop.xlane.xlu1 %836  ;;  %v865_v53 = vpop.xlane.xlu0 %864 }
 0x236   :  { %v898_v57 = vmul.f32 0.03125, %v837_v21  ;;  %v912_v56 = vmul.f32 0.03125, %v865_v53 }
 0x237   :  { %v964_v23 = vsub.f32 1.5, %v963_v28 }
 0x238   :  { %v1483_v30 = vpop.eup %1482  ;;  %v930_v36 = vadd.f32 1e-12, %v898_v57  ;;  %v2205_v15 = vadd.f32 1e-12, %v912_v56 }
 0x239   :  { %v965_v17 = vmul.f32 %v1481_v52, %v964_v23  ;;  %v971_v29 = vmul.f32 %v1483_v30, %v929_v12  ;;  %vm977_vm4 = vweird.f32 %v1483_v30 }
 0x23a   :  { %1484 = vrsqrt.f32 %v930_v36  ;;  %vm978_vm6 = vmor %vm976_vm5, %vm977_vm4  ;;  %vm986_vm9 = vweird.f32 %v930_v36  ;;  %vm1126_vm11 = vweird.f32 %v2205_v15 }
 0x23b   :  { %v969_v50 = vsel %vm968_vm3, %v1481_v52, %v965_v17  ;;  %v972_v4 = vmul.f32 %v1483_v30, %v971_v29  ;;  %1486 = vrsqrt.f32 %v2205_v15 }
 0x23c   :  { %v1280_v41 = vmul.f32 %v969_v50, %v2006_v31 }
 0x23d   :  { %v973_v19 = vmul.f32 0.5, %v972_v4  ;;  %v867_v45 = vpop.xlane.xlu1 %866  ;;  %v839_v20 = vpop.xlane.xlu2 %838 }
 0x23e   :  { %v1316_v13 = vmul.f32 %v2210_v25, %v1280_v41  ;;  %v913_v60 = vmul.f32 0.03125, %v867_v45  ;;  %v899_v33 = vmul.f32 0.03125, %v839_v20 }
 0x23f   :  { %v974_v46 = vsub.f32 1.5, %v973_v19 }
 0x240   :  { %v1485_v10 = vpop.eup %1484  ;;  %v1352_v49 = vadd.f32 %v2216_v5, %v1316_v13  ;;  %v2221_v47 = vadd.f32 1e-12, %v913_v60  ;;  %v2223_v51 = vadd.f32 1e-12, %v899_v33 }
 0x241   :  { %v1487_v52 = vpop.eup %1486  ;;  %v975_v39 = vmul.f32 %v1483_v30, %v974_v46  ;;  %v981_v31 = vmul.f32 %v1485_v10, %v930_v36  ;;  %v841_v16 = vpop.xlane.xlu0 %840  ;;  %vm987_vm7 = vweird.f32 %v1485_v10 }
 0x242   :  { %1384 = vst [vmem:[#allocation9] sm:$0xff] %v1352_v49  ;;  %v1121_v14 = vmul.f32 %v1487_v52, %v2205_v15  ;;  %1488 = vrsqrt.f32 %v2221_v47  ;;  %v900_v56 = vmul.f32 0.03125, %v841_v16  ;;  %vm1127_vm8 = vweird.f32 %v1487_v52  ;;  %vm988_vm10 = vmor %vm986_vm9, %vm987_vm7 }
 0x243   :  { %v979_v28 = vsel %vm978_vm6, %v1483_v30, %v975_v39  ;;  %v982_v21 = vmul.f32 %v1485_v10, %v981_v31  ;;  %1490 = vrsqrt.f32 %v2223_v51  ;;  %vm1128_vm12 = vmor %vm1126_vm11, %vm1127_vm8  ;;  %vm1136_vm15 = vweird.f32 %v2221_v47 }
 0x244   :  { %v1281_v53 = vmul.f32 %v979_v28, %v2020_v38  ;;  %v1122_v57 = vmul.f32 %v1487_v52, %v1121_v14  ;;  %v2230_v50 = vadd.f32 1e-12, %v900_v56  ;;  %vm996_vm1 = vweird.f32 %v2223_v51 }
 0x245   :  { %v983_v23 = vmul.f32 0.5, %v982_v21  ;;  %v869_v17 = vpop.xlane.xlu2 %868 }
 0x246   :  { %v1317_v12 = vmul.f32 %v2210_v25, %v1281_v53  ;;  %v1123_v29 = vmul.f32 0.5, %v1122_v57  ;;  %v914_v4 = vmul.f32 0.03125, %v869_v17  ;;  %1492 = vrsqrt.f32 %v2230_v50 }
 0x247   :  { %v984_v41 = vsub.f32 1.5, %v983_v23  ;;  %vm1006_vm4 = vweird.f32 %v2230_v50 }
 0x248   :  { %v1489_v19 = vpop.eup %1488  ;;  %v1353_v30 = vadd.f32 %v2216_v5, %v1317_v12  ;;  %v1124_v45 = vsub.f32 1.5, %v1123_v29  ;;  %v2235_v60 = vadd.f32 1e-12, %v914_v4 }
 0x249   :  { %v1491_v38 = vpop.eup %1490  ;;  %v985_v20 = vmul.f32 %v1485_v10, %v984_v41  ;;  %v1131_v13 = vmul.f32 %v1489_v19, %v2221_v47  ;;  %v843_v33 = vpop.xlane.xlu1 %842  ;;  %vm1137_vm13 = vweird.f32 %v1489_v19 }
 0x24a   :  { %1385 = vst [vmem:[#allocation9 + $0x8] sm:$0xff] %v1353_v30  ;;  %v1125_v46 = vmul.f32 %v1487_v52, %v1124_v45  ;;  %v991_v49 = vmul.f32 %v1491_v38, %v2223_v51  ;;  %v901_v39 = vmul.f32 0.03125, %v843_v33  ;;  %v871_v31 = vpop.xlane.xlu0 %870  ;;  %1494 = vrsqrt.f32 %v2235_v60  ;;  %vm1138_vm0 = vmor %vm1136_vm15, %vm1137_vm13 }
 0x24b   :  { %v989_v16 = vsel %vm988_vm10, %v1485_v10, %v985_v20  ;;  %v1132_v14 = vmul.f32 %v1489_v19, %v1131_v13  ;;  %v915_v15 = vmul.f32 0.03125, %v871_v31  ;;  %vm997_vm14 = vweird.f32 %v1491_v38 }
 0x24c   :  { %v1282_v36 = vmul.f32 %v989_v16, %v2031_v54  ;;  %v1129_v28 = vsel %vm1128_vm12, %v1487_v52, %v1125_v46  ;;  %v992_v21 = vmul.f32 %v1491_v38, %v991_v49  ;;  %v2242_v53 = vadd.f32 1e-12, %v901_v39  ;;  %v1493_v23 = vpop.eup %1492  ;;  %vm998_vm2 = vmor %vm996_vm1, %vm997_vm14 }
 0x24d   :  { %v1296_v57 = vmul.f32 %v1129_v28, %v2028_v63  ;;  %v1133_v56 = vmul.f32 0.5, %v1132_v14  ;;  %v1001_v54 = vmul.f32 %v1493_v23, %v2230_v50  ;;  %v2250_v41 = vadd.f32 1e-12, %v915_v15 }
 0x24e   :  { %v1318_v17 = vmul.f32 %v2210_v25, %v1282_v36  ;;  %v993_v12 = vmul.f32 0.5, %v992_v21  ;;  %1496 = vrsqrt.f32 %v2242_v53  ;;  %vm1007_vm3 = vweird.f32 %v1493_v23 }
 0x24f   :  { %v1332_v10 = vmul.f32 %v2210_v25, %v1296_v57  ;;  %v1134_v29 = vsub.f32 1.5, %v1133_v56  ;;  %v1002_v20 = vmul.f32 %v1493_v23, %v1001_v54  ;;  %1498 = vrsqrt.f32 %v2250_v41  ;;  %vm1008_vm5 = vmor %vm1006_vm4, %vm1007_vm3 }
 0x250   :  { %v1354_v52 = vadd.f32 %v2216_v5, %v1318_v17  ;;  %v994_v4 = vsub.f32 1.5, %v993_v12  ;;  %v2252_v63 = vpop.eup %1494  ;;  %vm1146_vm7 = vweird.f32 %v2235_v60  ;;  %vm1016_vm10 = vweird.f32 %v2242_v53 }
 0x251   :  { %v1368_v30 = vadd.f32 %v2216_v5, %v1332_v10  ;;  %v1135_v45 = vmul.f32 %v1489_v19, %v1134_v29  ;;  %v873_v13 = vpop.xlane.xlu1 %872  ;;  %v845_v33 = vpop.xlane.xlu2 %844  ;;  %v1141_v49 = vmul.f32 %v2252_v63, %v2235_v60  ;;  %v1003_v31 = vmul.f32 0.5, %v1002_v20 }
 0x252   :  { %1386 = vst [vmem:[#allocation9 + $0x10] sm:$0xff] %v1354_v52  ;;  %v995_v46 = vmul.f32 %v1491_v38, %v994_v4  ;;  %v916_v16 = vmul.f32 0.03125, %v873_v13  ;;  %v902_v21 = vmul.f32 0.03125, %v845_v33  ;;  %vm1147_vm6 = vweird.f32 %v2252_v63 }
 0x253   :  { %1400 = vst [vmem:[#allocation9 + $0x80] sm:$0xff] %v1368_v30  ;;  %v1139_v39 = vsel %vm1138_vm0, %v1489_v19, %v1135_v45  ;;  %v1142_v28 = vmul.f32 %v2252_v63, %v1141_v49  ;;  %v1004_v57 = vsub.f32 1.5, %v1003_v31  ;;  %vm1148_vm8 = vmor %vm1146_vm7, %vm1147_vm6  ;;  %vm1156_vm13 = vweird.f32 %v2250_v41 }
 0x254   :  { %v1497_v47 = vpop.eup %1496  ;;  %v1297_v14 = vmul.f32 %v1139_v39, %v2040_v8  ;;  %v999_v36 = vsel %vm998_vm2, %v1491_v38, %v995_v46  ;;  %v2266_v17 = vadd.f32 1e-12, %v916_v16  ;;  %v2268_v12 = vadd.f32 1e-12, %v902_v21 }
 0x255   :  { %v1283_v51 = vmul.f32 %v999_v36, %v2043_v18  ;;  %v1011_v56 = vmul.f32 %v1497_v47, %v2242_v53  ;;  %v1143_v19 = vmul.f32 0.5, %v1142_v28  ;;  %v1005_v8 = vmul.f32 %v1493_v23, %v1004_v57  ;;  %v1499_v29 = vpop.eup %1498 }
 0x256   :  { %v1333_v15 = vmul.f32 %v2210_v25, %v1297_v14  ;;  %1500 = vrsqrt.f32 %v2266_v17  ;;  %v1151_v45 = vmul.f32 %v1499_v29, %v2250_v41  ;;  %vm1017_vm9 = vweird.f32 %v1497_v47 }
 0x257   :  { %v1319_v10 = vmul.f32 %v2210_v25, %v1283_v51  ;;  %v1012_v38 = vmul.f32 %v1497_v47, %v1011_v56  ;;  %v1144_v54 = vsub.f32 1.5, %v1143_v19  ;;  %v1009_v4 = vsel %vm1008_vm5, %v1493_v23, %v1005_v8  ;;  %vm1018_vm11 = vmor %vm1016_vm10, %vm1017_vm9 }
 0x258   :  { %v1369_v18 = vadd.f32 %v2216_v5, %v1333_v15  ;;  %v1284_v50 = vmul.f32 %v1009_v4, %v2052_v7  ;;  %1502 = vrsqrt.f32 %v2268_v12  ;;  %v1152_v49 = vmul.f32 %v1499_v29, %v1151_v45 }
 0x259   :  { %v1355_v52 = vadd.f32 %v2216_v5, %v1319_v10  ;;  %v1013_v30 = vmul.f32 0.5, %v1012_v38  ;;  %v875_v20 = vpop.xlane.xlu2 %874  ;;  %v847_v13 = vpop.xlane.xlu0 %846  ;;  %v1145_v33 = vmul.f32 %v2252_v63, %v1144_v54  ;;  %vm1157_vm12 = vweird.f32 %v1499_v29 }
 0x25a   :  { %1401 = vst [vmem:[#allocation9 + $0x88] sm:$0xff] %v1369_v18  ;;  %v917_v23 = vmul.f32 0.03125, %v875_v20  ;;  %v1320_v39 = vmul.f32 %v2210_v25, %v1284_v50  ;;  %v903_v16 = vmul.f32 0.03125, %v847_v13  ;;  %v1153_v36 = vmul.f32 0.5, %v1152_v49  ;;  %vm1158_vm14 = vmor %vm1156_vm13, %vm1157_vm12 }
 0x25b   :  { %1387 = vst [vmem:[#allocation9 + $0x18] sm:$0xff] %v1355_v52  ;;  %v1014_v46 = vsub.f32 1.5, %v1013_v30  ;;  %v1149_v31 = vsel %vm1148_vm8, %v2252_v63, %v1145_v33  ;;  %vm1166_vm0 = vweird.f32 %v2266_v17  ;;  %vm1026_vm3 = vweird.f32 %v2268_v12 }
 0x25c   :  { %v1298_v7 = vmul.f32 %v1149_v31, %v2058_v42  ;;  %v2285_v60 = vadd.f32 1e-12, %v917_v23  ;;  %v1501_v28 = vpop.eup %1500  ;;  %v1356_v21 = vadd.f32 %v2216_v5, %v1320_v39  ;;  %v2288_v51 = vadd.f32 1e-12, %v903_v16 }
 0x25d   :  { %v1015_v14 = vmul.f32 %v1497_v47, %v1014_v46  ;;  %v1154_v63 = vsub.f32 1.5, %v1153_v36  ;;  %v1161_v53 = vmul.f32 %v1501_v28, %v2266_v17  ;;  %vm1167_vm15 = vweird.f32 %v1501_v28 }
 0x25e   :  { %v1334_v57 = vmul.f32 %v2210_v25, %v1298_v7  ;;  %v1503_v15 = vpop.eup %1502  ;;  %1388 = vst [vmem:[#allocation9 + $0x20] sm:$0xff] %v1356_v21  ;;  %1504 = vrsqrt.f32 %v2285_v60  ;;  %vm1168_vm2 = vmor %vm1166_vm0, %vm1167_vm15  ;;  %vm1176_vm6 = vweird.f32 %v2285_v60  ;;  %vm1036_vm9 = vweird.f32 %v2288_v51 }
 0x25f   :  { %v1019_v56 = vsel %vm1018_vm11, %v1497_v47, %v1015_v14  ;;  %v1155_v10 = vmul.f32 %v1499_v29, %v1154_v63  ;;  %v1162_v8 = vmul.f32 %v1501_v28, %v1161_v53  ;;  %v1021_v38 = vmul.f32 %v1503_v15, %v2268_v12 }
 0x260   :  { %v1285_v42 = vmul.f32 %v1019_v56, %v2067_v22  ;;  %v1370_v19 = vadd.f32 %v2216_v5, %v1334_v57  ;;  %1506 = vrsqrt.f32 %v2288_v51  ;;  %vm1027_vm1 = vweird.f32 %v1503_v15 }
 0x261   :  { %v849_v18 = vpop.xlane.xlu1 %848  ;;  %v877_v54 = vpop.xlane.xlu0 %876  ;;  %v1159_v22 = vsel %vm1158_vm14, %v1499_v29, %v1155_v10  ;;  %v1163_v52 = vmul.f32 0.5, %v1162_v8  ;;  %v1022_v41 = vmul.f32 %v1503_v15, %v1021_v38  ;;  %vm1028_vm4 = vmor %vm1026_vm3, %vm1027_vm1 }
 0x262   :  { %v1321_v47 = vmul.f32 %v2210_v25, %v1285_v42  ;;  %1402 = vst [vmem:[#allocation9 + $0x90] sm:$0xff] %v1370_v19  ;;  %v904_v4 = vmul.f32 0.03125, %v849_v18  ;;  %v1299_v45 = vmul.f32 %v1159_v22, %v2064_v43  ;;  %v918_v20 = vmul.f32 0.03125, %v877_v54 }
 0x263   :  { %v1164_v13 = vsub.f32 1.5, %v1163_v52  ;;  %v1023_v50 = vmul.f32 0.5, %v1022_v41 }
 0x264   :  { %v1357_v30 = vadd.f32 %v2216_v5, %v1321_v47  ;;  %v2302_v33 = vadd.f32 1e-12, %v904_v4  ;;  %v1505_v46 = vpop.eup %1504  ;;  %v1335_v49 = vmul.f32 %v2210_v25, %v1299_v45  ;;  %v2306_v29 = vadd.f32 1e-12, %v918_v20 }
 0x265   :  { %v1165_v23 = vmul.f32 %v1501_v28, %v1164_v13  ;;  %v1024_v39 = vsub.f32 1.5, %v1023_v50  ;;  %v1171_v31 = vmul.f32 %v1505_v46, %v2285_v60  ;;  %vm1177_vm5 = vweird.f32 %v1505_v46 }
 0x266   :  { %1389 = vst [vmem:[#allocation9 + $0x28] sm:$0xff] %v1357_v30  ;;  %v1507_v43 = vpop.eup %1506  ;;  %v1371_v16 = vadd.f32 %v2216_v5, %v1335_v49  ;;  %1508 = vrsqrt.f32 %v2302_v33  ;;  %vm1178_vm8 = vmor %vm1176_vm6, %vm1177_vm5  ;;  %vm1046_vm11 = vweird.f32 %v2302_v33  ;;  %vm1186_vm15 = vweird.f32 %v2306_v29 }
 0x267   :  { %v1169_v7 = vsel %vm1168_vm2, %v1501_v28, %v1165_v23  ;;  %v1025_v14 = vmul.f32 %v1503_v15, %v1024_v39  ;;  %v1172_v36 = vmul.f32 %v1505_v46, %v1171_v31  ;;  %v1031_v17 = vmul.f32 %v1507_v43, %v2288_v51 }
 0x268   :  { %1403 = vst [vmem:[#allocation9 + $0x98] sm:$0xff] %v1371_v16  ;;  %v1300_v56 = vmul.f32 %v1169_v7, %v2076_v44  ;;  %1510 = vrsqrt.f32 %v2306_v29  ;;  %vm1037_vm7 = vweird.f32 %v1507_v43 }
 0x269   :  { %v879_v21 = vpop.xlane.xlu1 %878  ;;  %v851_v57 = vpop.xlane.xlu2 %850  ;;  %v1029_v53 = vsel %vm1028_vm4, %v1503_v15, %v1025_v14  ;;  %v1173_v42 = vmul.f32 0.5, %v1172_v36  ;;  %v1032_v12 = vmul.f32 %v1507_v43, %v1031_v17  ;;  %vm1038_vm10 = vmor %vm1036_vm9, %vm1037_vm7 }
 0x26a   :  { %v919_v63 = vmul.f32 0.03125, %v879_v21  ;;  %v905_v19 = vmul.f32 0.03125, %v851_v57  ;;  %v1336_v28 = vmul.f32 %v2210_v25, %v1300_v56  ;;  %v1286_v10 = vmul.f32 %v1029_v53, %v2079_v26 }
 0x26b   :  { %v1174_v38 = vsub.f32 1.5, %v1173_v42  ;;  %v1033_v18 = vmul.f32 0.5, %v1032_v12 }
 0x26c   :  { %v2318_v8 = vadd.f32 1e-12, %v919_v63  ;;  %v2320_v54 = vadd.f32 1e-12, %v905_v19  ;;  %v1509_v44 = vpop.eup %1508  ;;  %v1372_v47 = vadd.f32 %v2216_v5, %v1336_v28  ;;  %v1322_v22 = vmul.f32 %v2210_v25, %v1286_v10 }
 0x26d   :  { %v1175_v15 = vmul.f32 %v1505_v46, %v1174_v38  ;;  %v1034_v52 = vsub.f32 1.5, %v1033_v18  ;;  %v1041_v26 = vmul.f32 %v1509_v44, %v2302_v33  ;;  %vm1047_vm12 = vweird.f32 %v1509_v44 }
 0x26e   :  { %1512 = vrsqrt.f32 %v2318_v8  ;;  %v2327_v41 = vpop.eup %1510  ;;  %1404 = vst [vmem:[#allocation9 + $0xa0] sm:$0xff] %v1372_v47  ;;  %v1358_v4 = vadd.f32 %v2216_v5, %v1322_v22  ;;  %vm1048_vm14 = vmor %vm1046_vm11, %vm1047_vm12  ;;  %vm1196_vm1 = vweird.f32 %v2318_v8  ;;  %vm1056_vm5 = vweird.f32 %v2320_v54 }
 0x26f   :  { %1514 = vrsqrt.f32 %v2320_v54  ;;  %v1179_v30 = vsel %vm1178_vm8, %v1505_v46, %v1175_v15  ;;  %v1035_v60 = vmul.f32 %v1507_v43, %v1034_v52  ;;  %v1042_v45 = vmul.f32 %v1509_v44, %v1041_v26 }
 0x270   :  { %v1181_v20 = vmul.f32 %v2327_v41, %v2306_v29  ;;  %1390 = vst [vmem:[#allocation9 + $0x30] sm:$0xff] %v1358_v4  ;;  %v1301_v49 = vmul.f32 %v1179_v30, %v2088_v6  ;;  %vm1187_vm13 = vweird.f32 %v2327_v41 }
 0x271   :  { %v881_v13 = vpop.xlane.xlu2 %880  ;;  %v853_v50 = vpop.xlane.xlu0 %852  ;;  %v1039_v31 = vsel %vm1038_vm10, %v1507_v43, %v1035_v60  ;;  %v1043_v16 = vmul.f32 0.5, %v1042_v45  ;;  %vm1188_vm0 = vmor %vm1186_vm15, %vm1187_vm13 }
 0x272   :  { %v920_v23 = vmul.f32 0.03125, %v881_v13  ;;  %v906_v39 = vmul.f32 0.03125, %v853_v50  ;;  %v1182_v51 = vmul.f32 %v2327_v41, %v1181_v20  ;;  %v1337_v7 = vmul.f32 %v2210_v25, %v1301_v49 }
 0x273   :  { %v1287_v14 = vmul.f32 %v1039_v31, %v2091_v27  ;;  %v1044_v6 = vsub.f32 1.5, %v1043_v16 }
 0x274   :  { %v1513_v46 = vpop.eup %1512  ;;  %v2341_v36 = vadd.f32 1e-12, %v920_v23  ;;  %v2343_v17 = vadd.f32 1e-12, %v906_v39  ;;  %v1183_v21 = vmul.f32 0.5, %v1182_v51  ;;  %v1373_v56 = vadd.f32 %v2216_v5, %v1337_v7 }
 0x275   :  { %v1191_v57 = vmul.f32 %v1513_v46, %v2318_v8  ;;  %v1515_v43 = vpop.eup %1514  ;;  %v1323_v63 = vmul.f32 %v2210_v25, %v1287_v14  ;;  %v1045_v53 = vmul.f32 %v1509_v44, %v1044_v6  ;;  %vm1197_vm2 = vweird.f32 %v1513_v46 }
 0x276   :  { %1516 = vrsqrt.f32 %v2341_v36  ;;  %v1184_v27 = vsub.f32 1.5, %v1183_v21  ;;  %v1051_v12 = vmul.f32 %v1515_v43, %v2320_v54  ;;  %1405 = vst [vmem:[#allocation9 + $0xa8] sm:$0xff] %v1373_v56  ;;  %vm1057_vm3 = vweird.f32 %v1515_v43  ;;  %vm1198_vm4 = vmor %vm1196_vm1, %vm1197_vm2 }
 0x277   :  { %v1192_v42 = vmul.f32 %v1513_v46, %v1191_v57  ;;  %v1359_v19 = vadd.f32 %v2216_v5, %v1323_v63  ;;  %1518 = vrsqrt.f32 %v2343_v17  ;;  %v1049_v28 = vsel %vm1048_vm14, %v1509_v44, %v1045_v53  ;;  %vm1058_vm6 = vmor %vm1056_vm5, %vm1057_vm3 }
 0x278   :  { %v1185_v10 = vmul.f32 %v2327_v41, %v1184_v27  ;;  %v1052_v18 = vmul.f32 %v1515_v43, %v1051_v12  ;;  %v1288_v15 = vmul.f32 %v1049_v28, %v2100_v40  ;;  %vm1206_vm7 = vweird.f32 %v2341_v36 }
 0x279   :  { %v1193_v38 = vmul.f32 0.5, %v1192_v42  ;;  %v855_v47 = vpop.xlane.xlu1 %854  ;;  %v883_v22 = vpop.xlane.xlu0 %882  ;;  %1391 = vst [vmem:[#allocation9 + $0x38] sm:$0xff] %v1359_v19  ;;  %vm1066_vm11 = vweird.f32 %v2343_v17 }
 0x27a   :  { %v907_v33 = vmul.f32 0.03125, %v855_v47  ;;  %v921_v52 = vmul.f32 0.03125, %v883_v22  ;;  %v1189_v29 = vsel %vm1188_vm0, %v2327_v41, %v1185_v10  ;;  %v1053_v44 = vmul.f32 0.5, %v1052_v18 }
 0x27b   :  { %v1194_v26 = vsub.f32 1.5, %v1193_v38  ;;  %v1324_v30 = vmul.f32 %v2210_v25, %v1288_v15  ;;  %v1302_v60 = vmul.f32 %v1189_v29, %v2103_v37 }
 0x27c   :  { %v1517_v4 = vpop.eup %1516  ;;  %v2364_v45 = vadd.f32 1e-12, %v907_v33  ;;  %v2366_v40 = vadd.f32 1e-12, %v921_v52  ;;  %v1054_v13 = vsub.f32 1.5, %v1053_v44 }
 0x27d   :  { %v1195_v20 = vmul.f32 %v1513_v46, %v1194_v26  ;;  %v1201_v50 = vmul.f32 %v1517_v4, %v2341_v36  ;;  %v1519_v49 = vpop.eup %1518  ;;  %v1360_v41 = vadd.f32 %v2216_v5, %v1324_v30  ;;  %v1338_v23 = vmul.f32 %v2210_v25, %v1302_v60 }
 0x27e   :  { %1520 = vrsqrt.f32 %v2364_v45  ;;  %v1055_v39 = vmul.f32 %v1515_v43, %v1054_v13  ;;  %v1061_v16 = vmul.f32 %v1519_v49, %v2343_v17  ;;  %vm1207_vm8 = vweird.f32 %v1517_v4 }
 0x27f   :  { %v1199_v37 = vsel %vm1198_vm4, %v1513_v46, %v1195_v20  ;;  %v1202_v31 = vmul.f32 %v1517_v4, %v1201_v50  ;;  %1392 = vst [vmem:[#allocation9 + $0x40] sm:$0xff] %v1360_v41  ;;  %v1374_v51 = vadd.f32 %v2216_v5, %v1338_v23  ;;  %1522 = vrsqrt.f32 %v2366_v40  ;;  %vm1208_vm10 = vmor %vm1206_vm7, %vm1207_vm8 }
 0x280   :  { %v1303_v7 = vmul.f32 %v1199_v37, %v2112_v0  ;;  %v1059_v8 = vsel %vm1058_vm6, %v1515_v43, %v1055_v39  ;;  %v1062_v6 = vmul.f32 %v1519_v49, %v1061_v16  ;;  %vm1067_vm9 = vweird.f32 %v1519_v49 }
 0x281   :  { %v1203_v14 = vmul.f32 0.5, %v1202_v31  ;;  %v885_v54 = vpop.xlane.xlu1 %884  ;;  %v857_v21 = vpop.xlane.xlu2 %856  ;;  %1406 = vst [vmem:[#allocation9 + $0xb0] sm:$0xff] %v1374_v51  ;;  %v1289_v57 = vmul.f32 %v1059_v8, %v2115_v61  ;;  %vm1068_vm12 = vmor %vm1066_vm11, %vm1067_vm9  ;;  %vm1076_vm13 = vweird.f32 %v2364_v45  ;;  %vm1216_vm1 = vweird.f32 %v2366_v40 }
 0x282   :  { %v1339_v46 = vmul.f32 %v2210_v25, %v1303_v7  ;;  %v922_v56 = vmul.f32 0.03125, %v885_v54  ;;  %v908_v63 = vmul.f32 0.03125, %v857_v21  ;;  %v1063_v0 = vmul.f32 0.5, %v1062_v6 }
 0x283   :  { %v1204_v53 = vsub.f32 1.5, %v1203_v14  ;;  %v1325_v43 = vmul.f32 %v2210_v25, %v1289_v57 }
 0x284   :  { %v1521_v27 = vpop.eup %1520  ;;  %v1375_v42 = vadd.f32 %v2216_v5, %v1339_v46  ;;  %v2385_v12 = vadd.f32 1e-12, %v922_v56  ;;  %v2387_v19 = vadd.f32 1e-12, %v908_v63  ;;  %v1064_v10 = vsub.f32 1.5, %v1063_v0 }
 0x285   :  { %v1205_v28 = vmul.f32 %v1517_v4, %v1204_v53  ;;  %v1071_v61 = vmul.f32 %v1521_v27, %v2364_v45  ;;  %v1523_v38 = vpop.eup %1522  ;;  %v1361_v18 = vadd.f32 %v2216_v5, %v1325_v43  ;;  %vm1077_vm14 = vweird.f32 %v1521_v27 }
 0x286   :  { %1407 = vst [vmem:[#allocation9 + $0xb8] sm:$0xff] %v1375_v42  ;;  %1524 = vrsqrt.f32 %v2385_v12  ;;  %v1065_v22 = vmul.f32 %v1519_v49, %v1064_v10  ;;  %v1211_v33 = vmul.f32 %v1523_v38, %v2366_v40  ;;  %vm1217_vm15 = vweird.f32 %v1523_v38  ;;  %vm1078_vm0 = vmor %vm1076_vm13, %vm1077_vm14 }
 0x287   :  { %v1209_v47 = vsel %vm1208_vm10, %v1517_v4, %v1205_v28  ;;  %v1072_v15 = vmul.f32 %v1521_v27, %v1071_v61  ;;  %1393 = vst [vmem:[#allocation9 + $0x48] sm:$0xff] %v1361_v18  ;;  %1526 = vrsqrt.f32 %v2387_v19  ;;  %vm1218_vm2 = vmor %vm1216_vm1, %vm1217_vm15  ;;  %vm1226_vm3 = vweird.f32 %v2385_v12 }
 0x288   :  { %v1304_v52 = vmul.f32 %v1209_v47, %v2124_v1  ;;  %v1069_v29 = vsel %vm1068_vm12, %v1519_v49, %v1065_v22  ;;  %v1212_v44 = vmul.f32 %v1523_v38, %v1211_v33  ;;  %vm1086_vm7 = vweird.f32 %v2387_v19 }
 0x289   :  { %v1073_v26 = vmul.f32 0.5, %v1072_v15  ;;  %v887_v36 = vpop.xlane.xlu2 %886  ;;  %v859_v30 = vpop.xlane.xlu0 %858  ;;  %v1290_v60 = vmul.f32 %v1069_v29, %v2127_v2 }
 0x28a   :  { %v1340_v17 = vmul.f32 %v2210_v25, %v1304_v52  ;;  %v923_v4 = vmul.f32 0.03125, %v887_v36  ;;  %v909_v20 = vmul.f32 0.03125, %v859_v30  ;;  %v1213_v50 = vmul.f32 0.5, %v1212_v44 }
 0x28b   :  { %v1074_v13 = vsub.f32 1.5, %v1073_v26  ;;  %v1326_v49 = vmul.f32 %v2210_v25, %v1290_v60 }
 0x28c   :  { %v1525_v1 = vpop.eup %1524  ;;  %v1376_v41 = vadd.f32 %v2216_v5, %v1340_v17  ;;  %v2403_v23 = vadd.f32 1e-12, %v923_v4  ;;  %v2405_v37 = vadd.f32 1e-12, %v909_v20  ;;  %v1214_v31 = vsub.f32 1.5, %v1213_v50 }
 0x28d   :  { %v1075_v39 = vmul.f32 %v1521_v27, %v1074_v13  ;;  %v1221_v2 = vmul.f32 %v1525_v1, %v2385_v12  ;;  %v1527_v16 = vpop.eup %1526  ;;  %v1362_v51 = vadd.f32 %v2216_v5, %v1326_v49  ;;  %vm1227_vm4 = vweird.f32 %v1525_v1 }
 0x28e   :  { %1408 = vst [vmem:[#allocation9 + $0xc0] sm:$0xff] %v1376_v41  ;;  %1528 = vrsqrt.f32 %v2403_v23  ;;  %v1215_v8 = vmul.f32 %v1523_v38, %v1214_v31  ;;  %v1081_v6 = vmul.f32 %v1527_v16, %v2387_v19  ;;  %vm1087_vm5 = vweird.f32 %v1527_v16  ;;  %vm1228_vm6 = vmor %vm1226_vm3, %vm1227_vm4 }
 0x28f   :  { %v1079_v7 = vsel %vm1078_vm0, %v1521_v27, %v1075_v39  ;;  %v1222_v14 = vmul.f32 %v1525_v1, %v1221_v2  ;;  %1394 = vst [vmem:[#allocation9 + $0x50] sm:$0xff] %v1362_v51  ;;  %1530 = vrsqrt.f32 %v2405_v37  ;;  %vm1088_vm8 = vmor %vm1086_vm7, %vm1087_vm5  ;;  %vm1236_vm9 = vweird.f32 %v2403_v23 }
 0x290   :  { %v1291_v54 = vmul.f32 %v1079_v7, %v2136_v11  ;;  %v1219_v21 = vsel %vm1218_vm2, %v1523_v38, %v1215_v8  ;;  %v1082_v57 = vmul.f32 %v1527_v16, %v1081_v6  ;;  %vm1096_vm13 = vweird.f32 %v2405_v37 }
 0x291   :  { %v1223_v46 = vmul.f32 0.5, %v1222_v14  ;;  %v861_v45 = vpop.xlane.xlu1 %860  ;;  %v889_v56 = vpop.xlane.xlu0 %888  ;;  %v1305_v63 = vmul.f32 %v1219_v21, %v2139_v55 }
 0x292   :  { %v1327_v40 = vmul.f32 %v2210_v25, %v1291_v54  ;;  %v910_v53 = vmul.f32 0.03125, %v861_v45  ;;  %v924_v0 = vmul.f32 0.03125, %v889_v56  ;;  %v1083_v42 = vmul.f32 0.5, %v1082_v57 }
 0x293   :  { %v1224_v27 = vsub.f32 1.5, %v1223_v46  ;;  %v1341_v28 = vmul.f32 %v2210_v25, %v1305_v63 }
 0x294   :  { %v1529_v11 = vpop.eup %1528  ;;  %v1363_v43 = vadd.f32 %v2216_v5, %v1327_v40  ;;  %v2421_v10 = vadd.f32 1e-12, %v910_v53  ;;  %v2423_v61 = vadd.f32 1e-12, %v924_v0  ;;  %v1084_v18 = vsub.f32 1.5, %v1083_v42 }
 0x295   :  { %v1225_v38 = vmul.f32 %v1525_v1, %v1224_v27  ;;  %v1231_v55 = vmul.f32 %v1529_v11, %v2403_v23  ;;  %v1531_v47 = vpop.eup %1530  ;;  %v1377_v22 = vadd.f32 %v2216_v5, %v1341_v28  ;;  %vm1237_vm10 = vweird.f32 %v1529_v11 }
 0x296   :  { %1395 = vst [vmem:[#allocation9 + $0x58] sm:$0xff] %v1363_v43  ;;  %1532 = vrsqrt.f32 %v2421_v10  ;;  %v1085_v33 = vmul.f32 %v1527_v16, %v1084_v18  ;;  %v1091_v29 = vmul.f32 %v1531_v47, %v2405_v37  ;;  %vm1097_vm11 = vweird.f32 %v1531_v47  ;;  %vm1238_vm12 = vmor %vm1236_vm9, %vm1237_vm10 }
 0x297   :  { %v1229_v15 = vsel %vm1228_vm6, %v1525_v1, %v1225_v38  ;;  %v1232_v52 = vmul.f32 %v1529_v11, %v1231_v55  ;;  %1409 = vst [vmem:[#allocation9 + $0xc8] sm:$0xff] %v1377_v22  ;;  %1534 = vrsqrt.f32 %v2423_v61  ;;  %vm1098_vm14 = vmor %vm1096_vm13, %vm1097_vm11  ;;  %vm1106_vm0 = vweird.f32 %v2421_v10 }
 0x298   :  { %v1306_v26 = vmul.f32 %v1229_v15, %v2148_v59  ;;  %v1089_v44 = vsel %vm1088_vm8, %v1527_v16, %v1085_v33  ;;  %v1092_v30 = vmul.f32 %v1531_v47, %v1091_v29  ;;  %vm1246_vm3 = vweird.f32 %v2423_v61 }
 0x299   :  { %v1233_v36 = vmul.f32 0.5, %v1232_v52  ;;  %v891_v12 = vpop.xlane.xlu1 %890  ;;  %v863_v17 = vpop.xlane.xlu2 %862  ;;  %v1292_v60 = vmul.f32 %v1089_v44, %v2151_v62 }
 0x29a   :  { %v1342_v19 = vmul.f32 %v2210_v25, %v1306_v26  ;;  %v925_v4 = vmul.f32 0.03125, %v891_v12  ;;  %v911_v20 = vmul.f32 0.03125, %v863_v17  ;;  %v1093_v50 = vmul.f32 0.5, %v1092_v30 }
 0x29b   :  { %v1234_v13 = vsub.f32 1.5, %v1233_v36  ;;  %v1328_v41 = vmul.f32 %v2210_v25, %v1292_v60 }
 0x29c   :  { %v1533_v59 = vpop.eup %1532  ;;  %v1378_v1 = vadd.f32 %v2216_v5, %v1342_v19  ;;  %v2439_v49 = vadd.f32 1e-12, %v925_v4  ;;  %v2441_v39 = vadd.f32 1e-12, %v911_v20  ;;  %v1094_v2 = vsub.f32 1.5, %v1093_v50 }
 0x29d   :  { %v1235_v31 = vmul.f32 %v1529_v11, %v1234_v13  ;;  %v1101_v62 = vmul.f32 %v1533_v59, %v2421_v10  ;;  %v1535_v16 = vpop.eup %1534  ;;  %v1364_v51 = vadd.f32 %v2216_v5, %v1328_v41  ;;  %vm1107_vm15 = vweird.f32 %v1533_v59 }
 0x29e   :  { %1410 = vst [vmem:[#allocation9 + $0xd0] sm:$0xff] %v1378_v1  ;;  %1536 = vrsqrt.f32 %v2439_v49  ;;  %v1095_v8 = vmul.f32 %v1531_v47, %v1094_v2  ;;  %v1241_v6 = vmul.f32 %v1535_v16, %v2423_v61  ;;  %vm1247_vm1 = vweird.f32 %v1535_v16  ;;  %vm1108_vm2 = vmor %vm1106_vm0, %vm1107_vm15 }
 0x29f   :  { %v1239_v7 = vsel %vm1238_vm12, %v1529_v11, %v1235_v31  ;;  %v1102_v14 = vmul.f32 %v1533_v59, %v1101_v62  ;;  %1396 = vst [vmem:[#allocation9 + $0x60] sm:$0xff] %v1364_v51  ;;  %1538 = vrsqrt.f32 %v2441_v39  ;;  %vm1248_vm4 = vmor %vm1246_vm3, %vm1247_vm1  ;;  %vm1256_vm6 = vweird.f32 %v2439_v49  ;;  %v1544_v31 = vld [vmem:[%s2497_s5] ss:$0 sm:$0xff]  ;;  %s1654_s5 = smov [#allocation9]  }
 0x2a0   :  { %v1307_v54 = vmul.f32 %v1239_v7, %v2160_v24  ;;  %v1099_v21 = vsel %vm1098_vm14, %v1531_v47, %v1095_v8  ;;  %v1242_v57 = vmul.f32 %v1535_v16, %v1241_v6  ;;  %vm1116_vm9 = vweird.f32 %v2441_v39 }
 0x2a1   :  { %v1103_v46 = vmul.f32 0.5, %v1102_v14  ;;  %v893_v23 = vpop.xlane.xlu2 %892  ;;  %v1293_v37 = vmul.f32 %v1099_v21, %v2163_v48 }
 0x2a2   :  { %v1343_v45 = vmul.f32 %v2210_v25, %v1307_v54  ;;  %v926_v56 = vmul.f32 0.03125, %v893_v23  ;;  %v1243_v63 = vmul.f32 0.5, %v1242_v57 }
 0x2a3   :  { %v1104_v40 = vsub.f32 1.5, %v1103_v46  ;;  %v1329_v24 = vmul.f32 %v2210_v25, %v1293_v37 }
 0x2a4   :  { %v1537_v53 = vpop.eup %1536  ;;  %v1379_v0 = vadd.f32 %v2216_v5, %v1343_v45  ;;  %v2457_v27 = vadd.f32 1e-12, %v926_v56  ;;  %v1244_v11 = vsub.f32 1.5, %v1243_v63 }
 0x2a5   :  { %v1105_v42 = vmul.f32 %v1533_v59, %v1104_v40  ;;  %v1251_v43 = vmul.f32 %v1537_v53, %v2439_v49  ;;  %v895_v28 = vpop.xlane.xlu0 %894  ;;  %v1539_v48 = vpop.eup %1538  ;;  %v1365_v38 = vadd.f32 %v2216_v5, %v1329_v24  ;;  %vm1257_vm5 = vweird.f32 %v1537_v53 }
 0x2a6   :  { %1411 = vst [vmem:[#allocation9 + $0xd8] sm:$0xff] %v1379_v0  ;;  %1540 = vrsqrt.f32 %v2457_v27  ;;  %v927_v18 = vmul.f32 0.03125, %v895_v28  ;;  %v1245_v55 = vmul.f32 %v1535_v16, %v1244_v11  ;;  %v1111_v22 = vmul.f32 %v1539_v48, %v2441_v39  ;;  %vm1258_vm8 = vmor %vm1256_vm6, %vm1257_vm5  ;;  %v1545_v39 = vld [vmem:[%s2498_s6] ss:$0 sm:$0xff]  ;;  %s1420_s6 = sshll.u32 %s1654_s5, 4  ;;  %s1421_s6 = int_to_ptr.vmem [resolvable:$true] %s1420_s6 }
 0x2a7   :  { %v1109_v10 = vsel %vm1108_vm2, %v1533_v59, %v1105_v42  ;;  %v1252_v47 = vmul.f32 %v1537_v53, %v1251_v43  ;;  %1397 = vst [vmem:[#allocation9 + $0x68] sm:$0xff] %v1365_v38  ;;  %vm1117_vm7 = vweird.f32 %v1539_v48  ;;  %vm1266_vm12 = vweird.f32 %v2457_v27 }
 0x2a8   :  { %v1294_v15 = vmul.f32 %v1109_v10, %v2172_v58  ;;  %v959_v33 = vadd.f32 1e-12, %v927_v18  ;;  %v1249_v52 = vsel %vm1248_vm4, %v1535_v16, %v1245_v55  ;;  %v1112_v26 = vmul.f32 %v1539_v48, %v1111_v22  ;;  %vm1118_vm10 = vmor %vm1116_vm9, %vm1117_vm7 }
 0x2a9   :  { %v1253_v29 = vmul.f32 0.5, %v1252_v47  ;;  %v1308_v61 = vmul.f32 %v1249_v52, %v2175_v34 }
 0x2aa   :  { %v1330_v44 = vmul.f32 %v2210_v25, %v1294_v15  ;;  %1542 = vrsqrt.f32 %v959_v33  ;;  %v1113_v30 = vmul.f32 0.5, %v1112_v26  ;;  %vm1276_vm15 = vweird.f32 %v959_v33 }
 0x2ab   :  { %v1254_v36 = vsub.f32 1.5, %v1253_v29  ;;  %v1344_v19 = vmul.f32 %v2210_v25, %v1308_v61 }
 0x2ac   :  { %v1541_v12 = vpop.eup %1540  ;;  %v1366_v17 = vadd.f32 %v2216_v5, %v1330_v44  ;;  %v1114_v60 = vsub.f32 1.5, %v1113_v30 }
 0x2ad   :  { %v1255_v58 = vmul.f32 %v1537_v53, %v1254_v36  ;;  %v1261_v4 = vmul.f32 %v1541_v12, %v2457_v27  ;;  %v1380_v20 = vadd.f32 %v2216_v5, %v1344_v19  ;;  %vm1267_vm11 = vweird.f32 %v1541_v12 }
 0x2ae   :  { %1398 = vst [vmem:[#allocation9 + $0x70] sm:$0xff] %v1366_v17  ;;  %v1115_v13 = vmul.f32 %v1539_v48, %v1114_v60  ;;  %vm1268_vm13 = vmor %vm1266_vm12, %vm1267_vm11 }
 0x2af   :  { %v1259_v34 = vsel %vm1258_vm8, %v1537_v53, %v1255_v58  ;;  %v1262_v50 = vmul.f32 %v1541_v12, %v1261_v4  ;;  %1412 = vst [vmem:[#allocation9 + $0xe0] sm:$0xff] %v1380_v20 }
 0x2b0   :  { %v1543_v59 = vpop.eup %1542  ;;  %v1309_v25 = vmul.f32 %v1259_v34, %v2184_v32  ;;  %v1119_v1 = vsel %vm1118_vm10, %v1539_v48, %v1115_v13 }
 0x2b1   :  { %v1263_v41 = vmul.f32 0.5, %v1262_v50  ;;  %v1271_v49 = vmul.f32 %v1543_v59, %v959_v33  ;;  %v1295_v5 = vmul.f32 %v1119_v1, %v2187_v35  ;;  %vm1277_vm14 = vweird.f32 %v1543_v59 }
 0x2b2   :  { %v1345_v2 = vmul.f32 %v1544_v31, %v1309_v25  ;;  %vm1278_vm0 = vmor %vm1276_vm15, %vm1277_vm14 }
 0x2b3   :  { %v1264_v62 = vsub.f32 1.5, %v1263_v41  ;;  %v1272_v16 = vmul.f32 %v1543_v59, %v1271_v49  ;;  %v1331_v32 = vmul.f32 %v1544_v31, %v1295_v5 }
 0x2b4   :  { %v1381_v51 = vadd.f32 %v1545_v39, %v1345_v2 }
 0x2b5   :  { %v1265_v7 = vmul.f32 %v1541_v12, %v1264_v62  ;;  %v1273_v8 = vmul.f32 0.5, %v1272_v16  ;;  %v1367_v14 = vadd.f32 %v1545_v39, %v1331_v32 }
 0x2b6   :  { %1413 = vst [vmem:[#allocation9 + $0xe8] sm:$0xff] %v1381_v51 }
 0x2b7   :  { %v1269_v6 = vsel %vm1268_vm13, %v1541_v12, %v1265_v7  ;;  %v1274_v54 = vsub.f32 1.5, %v1273_v8  ;;  %1399 = vst [vmem:[#allocation9 + $0x78] sm:$0xff] %v1367_v14 }
 0x2b8   :  { %v1310_v35 = vmul.f32 %v1269_v6, %v2195_v9 }
 0x2b9   :  { %v1275_v21 = vmul.f32 %v1543_v59, %v1274_v54 }
 0x2ba   :  { %v1346_v46 = vmul.f32 %v1544_v31, %v1310_v35 }
 0x2bb   :  { %v1279_v57 = vsel %vm1278_vm0, %v1543_v59, %v1275_v21 }
 0x2bc   :  { %v1382_v23 = vadd.f32 %v1545_v39, %v1346_v46  ;;  %v1311_v45 = vmul.f32 %v1279_v57, %v2201_v3 }
 0x2be   :  { %1414 = vst [vmem:[#allocation9 + $0xf0] sm:$0xff] %v1382_v23  ;;  %v1347_v37 = vmul.f32 %v1544_v31, %v1311_v45 }
 0x2c0   :  { %v1383_v56 = vadd.f32 %v1545_v39, %v1347_v37 }
 0x2c2   :  { %1415 = vst [vmem:[#allocation9 + $0xf8] sm:$0xff] %v1383_v56 }
 0x2c3   :  { %1428 = dma.vmem_to_hbm [thread:$0]  %s1421_s6, 4096, %s1423_s27, [#allocation5], %s1649_s9, %s1649_s9, %s1650_s10  }
 0x2c4   :  { %1646 = dma.done.wait [#allocation5], 4096  }
 0x2c5   :  { %1647 = vsyncadd [#allocation5], 4294963200 }
 0x2c6   :  { %1433 = vsyncpa [#allocation4], 1 }
 0x2c7   :  { %1434 = vsyncpa [#allocation7], 1 }
 0x2c8   :  { %1435 = vsyncpa [#allocation5], 1 }

</bundles_post_ra>
